<compile_context>
chip_gen: v5e
topology: v5e:2x2
jax: 0.10.0
libtpu: 0.0.40
codegen_flags: <defaults>
</compile_context>

<pallas_src>
import jax
import jax.numpy as jnp
import numpy as np
from jax import lax
from jax.experimental import pallas as pl
from jax.experimental.pallas import tpu as pltpu

LANE = 128


def _round_up(v, m):
    return (v + m - 1) // m * m


def _bottleneck_kernel(x_ref, xt_ref, xb_ref,
                       w1_ref, s1_ref, b1_ref,
                       w2_ref, s2_ref, b2_ref,
                       w3_ref, s3_ref, b3_ref,
                       out_ref):
    """One (batch, row-tile) step of the fused Bottleneck forward.

    x_ref  : (1, TH, W, Cp)  main input tile (also the residual), bf16
    xt_ref : (1, 1,  W, Cp)  row just above the tile (clamped at image edge)
    xb_ref : (1, 1,  W, Cp)  row just below the tile (clamped at image edge)
    w1_ref : (Cp, Cmp)       conv1 weight, (in, out)
    w2_ref : (9*Cmp, Cmp)    conv2 weight, ((kh, kw, in) flattened, out)
    w3_ref : (Cmp, Cp)       conv3 weight, (in, out)
    s*/b*  : (1, Cmp|Cp)     folded BN scale / shift, f32
    out_ref: (1, TH, W, Cp)
    """
    _, TH, W, Cp = x_ref.shape
    Cmp = w1_ref.shape[1]

    r = pl.program_id(1)
    n_row_tiles = pl.num_programs(1)

    x = x_ref[...].reshape(TH * W, Cp)           # residual / conv1 input (bf16)
    xt = xt_ref[...].reshape(W, Cp)
    xb = xb_ref[...].reshape(W, Cp)

    # ---- conv1 (1x1) + bn1 + relu: halo-above + tile + halo-below in ONE matmul
    xin = jnp.concatenate([xt, x, xb], axis=0)   # (W + TH*W + W, Cp)
    o1 = jnp.dot(xin, w1_ref[...], preferred_element_type=jnp.float32)
    o1 = jnp.maximum(o1 * s1_ref[...] + b1_ref[...], 0.0)

    # Halo rows that fall outside the image are conv2's zero padding: mask them.
    top_keep = (r > 0).astype(jnp.float32)
    bot_keep = (r < n_row_tiles - 1).astype(jnp.float32)
    rows = jnp.concatenate(
        [o1[:W] * top_keep, o1[W:W + TH * W], o1[W + TH * W:] * bot_keep],
        axis=0).reshape(TH + 2, W, Cmp)          # (TH+2, W, Cmp), f32

    # ---- conv2 (3x3, stride 1, pad 1) as a single K = 9*Cmp matmul ----------
    # Column-shifted copies are built once (hoisted out of the 9 taps); the
    # kh taps are free leading-axis slices, so no padded scratch buffer exists.
    zcol = jnp.zeros((TH + 2, 1, Cmp), jnp.float32)
    left = jnp.concatenate([zcol, rows[:, :W - 1, :]], axis=1)   # col c -> c-1
    right = jnp.concatenate([rows[:, 1:, :], zcol], axis=1)      # col c -> c+1
    lcr = jnp.concatenate([left, rows, right], axis=-1)          # (TH+2, W, 3*Cmp)
    col = jnp.concatenate([lcr[0:TH], lcr[1:TH + 1], lcr[2:TH + 2]], axis=-1)
    col2d = col.reshape(TH * W, 9 * Cmp).astype(w2_ref.dtype)    # im2col slab
    o2 = jnp.dot(col2d, w2_ref[...], preferred_element_type=jnp.float32)
    o2 = jnp.maximum(o2 * s2_ref[...] + b2_ref[...], 0.0)

    # ---- conv3 (1x1) + bn3 + residual add + relu ----------------------------
    o3 = jnp.dot(o2.astype(w3_ref.dtype), w3_ref[...],
                 preferred_element_type=jnp.float32)
    o3 = o3 * s3_ref[...] + b3_ref[...]
    out = jnp.maximum(o3 + x.astype(jnp.float32), 0.0)
    out_ref[...] = out.reshape(1, TH, W, Cp).astype(out_ref.dtype)


def _fold_bn(gamma, beta, mean, var, eps=1e-5):
    scale = gamma / jnp.sqrt(var + eps)
    shift = beta - mean * scale
    return scale, shift


def bottleneck_forward(x_nhwc, params, *, row_tile=8,
                       mxu_dtype=jnp.bfloat16, out_dtype=None):
    """Fused Bottleneck forward (NHWC in / NHWC out, eval-mode BatchNorm).

    Matches the PyTorch module defaults: stride=1, groups=1, downsample=None.
    TODO(synk): stride>1, groups>1 and the optional `downsample` branch are not
    implemented (non-default in the reference module).
    """
    N, H, W, C = x_nhwc.shape
    out_dtype = mxu_dtype if out_dtype is None else out_dtype

    # PyTorch conv weights are (out, in, kh, kw); rearrange for channel matmuls.
    w1 = params["conv1_w"][:, :, 0, 0].T                       # (C,  Cm)
    w2 = jnp.transpose(params["conv2_w"], (2, 3, 1, 0))         # (3, 3, Cm, Cm)
    w3 = params["conv3_w"][:, :, 0, 0].T                        # (Cm, C)
    Cm = w1.shape[1]

    # Lane-dense channels: zero-pad to a multiple of 128 so matmul operands and
    # the output block are full 128-lane tiles (no-op for real ResNet widths).
    Cp, Cmp = _round_up(C, LANE), _round_up(Cm, LANE)
    x_p = jnp.pad(x_nhwc, ((0, 0), (0, 0), (0, 0), (0, Cp - C))) if Cp != C else x_nhwc
    x_p = x_p.astype(mxu_dtype)

    w1p = jnp.pad(w1, ((0, Cp - C), (0, Cmp - Cm))).astype(mxu_dtype)
    w2p = jnp.pad(w2, ((0, 0), (0, 0), (0, Cmp - Cm), (0, Cmp - Cm)))
    w2p = w2p.reshape(9 * Cmp, Cmp).astype(mxu_dtype)
    w3p = jnp.pad(w3, ((0, Cmp - Cm), (0, Cp - C))).astype(mxu_dtype)

    def _pad_vec(v, n):
        return jnp.pad(v, (0, n - v.shape[0])).reshape(1, n).astype(jnp.float32)

    s1, b1 = _fold_bn(*params["bn1"])
    s2, b2 = _fold_bn(*params["bn2"])
    s3, b3 = _fold_bn(*params["bn3"])
    s1p, b1p = _pad_vec(s1, Cmp), _pad_vec(b1, Cmp)
    s2p, b2p = _pad_vec(s2, Cmp), _pad_vec(b2, Cmp)
    s3p, b3p = _pad_vec(s3, Cp), _pad_vec(b3, Cp)

    # Row tiling (best when W is a multiple of 8 so in-kernel reshapes are free).
    TH = row_tile if (H % row_tile == 0) else H
    grid = (N, H // TH)

    x_spec = pl.BlockSpec((1, TH, W, Cp), lambda n, r: (n, r, 0, 0))
    # 1-row halo blocks: block size 1 along H => index map returns the row index.
    xt_spec = pl.BlockSpec((1, 1, W, Cp),
                           lambda n, r: (n, jnp.maximum(r * TH - 1, 0), 0, 0))
    xb_spec = pl.BlockSpec((1, 1, W, Cp),
                           lambda n, r: (n, jnp.minimum((r + 1) * TH, H - 1), 0, 0))
    out_spec = pl.BlockSpec((1, TH, W, Cp), lambda n, r: (n, r, 0, 0))

    def _full(a):
        nd = a.ndim
        return pl.BlockSpec(a.shape, lambda n, r: (0,) * nd)

    flops = 2 * N * H * W * (Cp * Cmp + 9 * Cmp * Cmp + Cmp * Cp)
    bytes_accessed = int(
        x_p.size * jnp.dtype(mxu_dtype).itemsize
        + N * H * W * Cp * jnp.dtype(out_dtype).itemsize
        + (w1p.size + w2p.size + w3p.size) * jnp.dtype(mxu_dtype).itemsize)

    out_padded = pl.pallas_call(
        _bottleneck_kernel,
        out_shape=jax.ShapeDtypeStruct((N, H, W, Cp), out_dtype),
        grid_spec=pltpu.PrefetchScalarGridSpec(
            num_scalar_prefetch=0,
            grid=grid,
            in_specs=[x_spec, xt_spec, xb_spec,
                      _full(w1p), _full(s1p), _full(b1p),
                      _full(w2p), _full(s2p), _full(b2p),
                      _full(w3p), _full(s3p), _full(b3p)],
            out_specs=out_spec),
        compiler_params=pltpu.CompilerParams(
            dimension_semantics=("parallel", "parallel"),
            vmem_limit_bytes=64 * 1024 * 1024),
        cost_estimate=pl.CostEstimate(flops=flops, transcendentals=0,
                                      bytes_accessed=bytes_accessed),
    )(x_p, x_p, x_p, w1p, s1p, b1p, w2p, s2p, b2p, w3p, s3p, b3p)

    return out_padded[..., :C] if Cp != C else out_padded


# ----------------------------- reference (pure JAX, NCHW) -------------------
def bottleneck_reference(x, params):
    def conv(x, w, pad=0):
        return lax.conv_general_dilated(
            x, w, window_strides=(1, 1), padding=[(pad, pad), (pad, pad)],
            dimension_numbers=("NCHW", "OIHW", "NCHW"))

    def bn(x, gamma, beta, mean, var, eps=1e-5):
        g = gamma[None, :, None, None]
        b = beta[None, :, None, None]
        m = mean[None, :, None, None]
        v = var[None, :, None, None]
        return g * (x - m) / jnp.sqrt(v + eps) + b

    out = jax.nn.relu(bn(conv(x, params["conv1_w"]), *params["bn1"]))
    out = jax.nn.relu(bn(conv(out, params["conv2_w"], pad=1), *params["bn2"]))
    out = bn(conv(out, params["conv3_w"]), *params["bn3"])
    return jax.nn.relu(out + x)


def make_params(key, inplanes, planes):
    ks = jax.random.split(key, 12)

    def bn_params(k):
        k1, k2, k3, k4 = jax.random.split(k, 4)
        gamma = 0.5 + jax.random.uniform(k1, (planes,), jnp.float32)
        beta = 0.1 * jax.random.normal(k2, (planes,), jnp.float32)
        mean = 0.1 * jax.random.normal(k3, (planes,), jnp.float32)
        var = 0.5 + jax.random.uniform(k4, (planes,), jnp.float32)
        return (gamma, beta, mean, var)

    return {
        "conv1_w": 0.1 * jax.random.normal(ks[0], (planes, inplanes, 1, 1), jnp.float32),
        "conv2_w": 0.1 * jax.random.normal(ks[1], (planes, planes, 3, 3), jnp.float32),
        "conv3_w": 0.1 * jax.random.normal(ks[2], (planes, planes, 1, 1), jnp.float32),
        "bn1": bn_params(ks[3]),
        "bn2": bn_params(ks[4]),
        "bn3": bn_params(ks[5]),
    }


if __name__ == "__main__":
    key = jax.random.PRNGKey(0)
    kx, kp = jax.random.split(key)

    N, C, H, W = 2, 32, 16, 16          # inplanes == planes (expansion = 1)
    x_nchw = jax.random.normal(kx, (N, C, H, W), jnp.float32)
    params = make_params(kp, inplanes=C, planes=C)

    # Kernel hot path is NHWC-native; this transpose is test-harness only.
    x_nhwc = jnp.transpose(x_nchw, (0, 2, 3, 1))

    fwd = jax.jit(bottleneck_forward)
    out_nhwc = jax.block_until_ready(fwd(x_nhwc, params))

    ref_nchw = jax.block_until_ready(bottleneck_reference(x_nchw, params))
    ref_nhwc = jnp.transpose(ref_nchw, (0, 2, 3, 1))

    # bf16 MXU operands + bf16 output => loose-ish tolerance vs f32 reference.
    np.testing.assert_allclose(
        np.asarray(out_nhwc.astype(jnp.float32)),
        np.asarray(ref_nhwc),
        rtol=5e-2, atol=5e-2)
    print("KERNEL_OK")
</pallas_src>

<mosaic_0001>
module attributes {stable_mosaic.version = 11 : i64} {
  func.func @_bottleneck_kernel(%arg0: i32, %arg1: i32, %arg2: memref<1x8x16x128xbf16, #tpu.memory_space<vmem>>, %arg3: memref<1x1x16x128xbf16, #tpu.memory_space<vmem>>, %arg4: memref<1x1x16x128xbf16, #tpu.memory_space<vmem>>, %arg5: memref<128x128xbf16, #tpu.memory_space<vmem>>, %arg6: memref<1x128xf32, #tpu.memory_space<vmem>>, %arg7: memref<1x128xf32, #tpu.memory_space<vmem>>, %arg8: memref<1152x128xbf16, #tpu.memory_space<vmem>>, %arg9: memref<1x128xf32, #tpu.memory_space<vmem>>, %arg10: memref<1x128xf32, #tpu.memory_space<vmem>>, %arg11: memref<128x128xbf16, #tpu.memory_space<vmem>>, %arg12: memref<1x128xf32, #tpu.memory_space<vmem>>, %arg13: memref<1x128xf32, #tpu.memory_space<vmem>>, %arg14: memref<1x8x16x128xbf16, #tpu.memory_space<vmem>>) attributes {dimension_semantics = [#tpu.dimension_semantics<parallel>, #tpu.dimension_semantics<parallel>], iteration_bounds = array<i64: 2, 2>, scalar_prefetch = 0 : i64, scratch_operands = 0 : i64, tpu.core_type = #tpu.core_type<tc>, window_params = [{transform_indices = @transform_0, window_bounds = array<i64: 1, 8, 16, 128>}, {transform_indices = @transform_1, window_bounds = array<i64: 1, 1, 16, 128>}, {transform_indices = @transform_2, window_bounds = array<i64: 1, 1, 16, 128>}, {pipeline_mode = #tpu.pipeline_mode<synchronous>, transform_indices = @transform_3, window_bounds = array<i64: 128, 128>}, {pipeline_mode = #tpu.pipeline_mode<synchronous>, transform_indices = @transform_4, window_bounds = array<i64: 1, 128>}, {pipeline_mode = #tpu.pipeline_mode<synchronous>, transform_indices = @transform_5, window_bounds = array<i64: 1, 128>}, {pipeline_mode = #tpu.pipeline_mode<synchronous>, transform_indices = @transform_6, window_bounds = array<i64: 1152, 128>}, {pipeline_mode = #tpu.pipeline_mode<synchronous>, transform_indices = @transform_7, window_bounds = array<i64: 1, 128>}, {pipeline_mode = #tpu.pipeline_mode<synchronous>, transform_indices = @transform_8, window_bounds = array<i64: 1, 128>}, {pipeline_mode = #tpu.pipeline_mode<synchronous>, transform_indices = @transform_9, window_bounds = array<i64: 128, 128>}, {pipeline_mode = #tpu.pipeline_mode<synchronous>, transform_indices = @transform_10, window_bounds = array<i64: 1, 128>}, {pipeline_mode = #tpu.pipeline_mode<synchronous>, transform_indices = @transform_11, window_bounds = array<i64: 1, 128>}, {transform_indices = @transform_12, window_bounds = array<i64: 1, 8, 16, 128>}]} {
    %c0 = arith.constant 0 : index
    %c0_0 = arith.constant 0 : index
    %c0_1 = arith.constant 0 : index
    %c0_2 = arith.constant 0 : index
    %0 = vector.load %arg2[%c0, %c0_0, %c0_1, %c0_2] : memref<1x8x16x128xbf16, #tpu.memory_space<vmem>>, vector<1x8x16x128xbf16>
    %1 = vector.shape_cast %0 : vector<1x8x16x128xbf16> to vector<128x128xbf16>
    %c0_3 = arith.constant 0 : index
    %c0_4 = arith.constant 0 : index
    %c0_5 = arith.constant 0 : index
    %c0_6 = arith.constant 0 : index
    %2 = vector.load %arg3[%c0_3, %c0_4, %c0_5, %c0_6] : memref<1x1x16x128xbf16, #tpu.memory_space<vmem>>, vector<1x1x16x128xbf16>
    %3 = vector.shape_cast %2 : vector<1x1x16x128xbf16> to vector<16x128xbf16>
    %c0_7 = arith.constant 0 : index
    %c0_8 = arith.constant 0 : index
    %c0_9 = arith.constant 0 : index
    %c0_10 = arith.constant 0 : index
    %4 = vector.load %arg4[%c0_7, %c0_8, %c0_9, %c0_10] : memref<1x1x16x128xbf16, #tpu.memory_space<vmem>>, vector<1x1x16x128xbf16>
    %5 = vector.shape_cast %4 : vector<1x1x16x128xbf16> to vector<16x128xbf16>
    %6 = tpu.concatenate %3, %1, %5 in 0 : vector<16x128xbf16>, vector<128x128xbf16>, vector<16x128xbf16> -> vector<160x128xbf16>
    %c0_11 = arith.constant 0 : index
    %c0_12 = arith.constant 0 : index
    %7 = vector.load %arg5[%c0_11, %c0_12] : memref<128x128xbf16, #tpu.memory_space<vmem>>, vector<128x128xbf16>
    %cst = arith.constant dense<0.000000e+00> : vector<160x128xf32>
    %8 = tpu.matmul %6, %7, %cst {dimension_numbers = #tpu.dot_dimension_numbers<[1], [0], [0], [1], [0, 0, 1, 1], [], []>} : vector<160x128xbf16>, vector<128x128xbf16>, vector<160x128xf32> -> vector<160x128xf32>
    %c0_13 = arith.constant 0 : index
    %c0_14 = arith.constant 0 : index
    %9 = vector.load %arg6[%c0_13, %c0_14] : memref<1x128xf32, #tpu.memory_space<vmem>>, vector<1x128xf32>
    %10 = vector.broadcast %9 : vector<1x128xf32> to vector<160x128xf32>
    %11 = arith.mulf %8, %10 : vector<160x128xf32>
    %c0_15 = arith.constant 0 : index
    %c0_16 = arith.constant 0 : index
    %12 = vector.load %arg7[%c0_15, %c0_16] : memref<1x128xf32, #tpu.memory_space<vmem>>, vector<1x128xf32>
    %13 = vector.broadcast %12 : vector<1x128xf32> to vector<160x128xf32>
    %14 = arith.addf %11, %13 : vector<160x128xf32>
    %cst_17 = arith.constant 0.000000e+00 : f32
    %15 = vector.broadcast %cst_17 : f32 to vector<160x128xf32>
    %16 = arith.maximumf %14, %15 : vector<160x128xf32>
    %c0_i32 = arith.constant 0 : i32
    %17 = arith.cmpi sgt, %arg1, %c0_i32 : i32
    %18 = arith.extui %17 : i1 to i32
    %19 = arith.sitofp %18 : i32 to f32
    %c1_i32 = arith.constant 1 : i32
    %20 = arith.cmpi slt, %arg1, %c1_i32 : i32
    %21 = arith.extui %20 : i1 to i32
    %22 = arith.sitofp %21 : i32 to f32
    %23 = vector.extract_strided_slice %16 {offsets = [0, 0], sizes = [16, 128], strides = [1, 1]} : vector<160x128xf32> to vector<16x128xf32>
    %24 = vector.broadcast %19 : f32 to vector<16x128xf32>
    %25 = arith.mulf %23, %24 : vector<16x128xf32>
    %26 = vector.extract_strided_slice %16 {offsets = [16, 0], sizes = [128, 128], strides = [1, 1]} : vector<160x128xf32> to vector<128x128xf32>
    %27 = vector.extract_strided_slice %16 {offsets = [144, 0], sizes = [16, 128], strides = [1, 1]} : vector<160x128xf32> to vector<16x128xf32>
    %28 = vector.broadcast %22 : f32 to vector<16x128xf32>
    %29 = arith.mulf %27, %28 : vector<16x128xf32>
    %30 = tpu.concatenate %25, %26, %29 in 0 : vector<16x128xf32>, vector<128x128xf32>, vector<16x128xf32> -> vector<160x128xf32>
    %31 = vector.shape_cast %30 : vector<160x128xf32> to vector<10x16x128xf32>
    %cst_18 = arith.constant 0.000000e+00 : f32
    %32 = vector.broadcast %cst_18 : f32 to vector<10x1x128xf32>
    %33 = vector.extract_strided_slice %31 {offsets = [0, 0, 0], sizes = [10, 15, 128], strides = [1, 1, 1]} : vector<10x16x128xf32> to vector<10x15x128xf32>
    %34 = tpu.concatenate %32, %33 in 1 : vector<10x1x128xf32>, vector<10x15x128xf32> -> vector<10x16x128xf32>
    %35 = vector.extract_strided_slice %31 {offsets = [0, 1, 0], sizes = [10, 15, 128], strides = [1, 1, 1]} : vector<10x16x128xf32> to vector<10x15x128xf32>
    %36 = tpu.concatenate %35, %32 in 1 : vector<10x15x128xf32>, vector<10x1x128xf32> -> vector<10x16x128xf32>
    %37 = tpu.concatenate %34, %31, %36 in 2 : vector<10x16x128xf32>, vector<10x16x128xf32>, vector<10x16x128xf32> -> vector<10x16x384xf32>
    %38 = vector.extract_strided_slice %37 {offsets = [0, 0, 0], sizes = [8, 16, 384], strides = [1, 1, 1]} : vector<10x16x384xf32> to vector<8x16x384xf32>
    %39 = vector.extract_strided_slice %37 {offsets = [1, 0, 0], sizes = [8, 16, 384], strides = [1, 1, 1]} : vector<10x16x384xf32> to vector<8x16x384xf32>
    %40 = vector.extract_strided_slice %37 {offsets = [2, 0, 0], sizes = [8, 16, 384], strides = [1, 1, 1]} : vector<10x16x384xf32> to vector<8x16x384xf32>
    %41 = tpu.concatenate %38, %39, %40 in 2 : vector<8x16x384xf32>, vector<8x16x384xf32>, vector<8x16x384xf32> -> vector<8x16x1152xf32>
    %42 = vector.shape_cast %41 : vector<8x16x1152xf32> to vector<128x1152xf32>
    %43 = arith.truncf %42 : vector<128x1152xf32> to vector<128x1152xbf16>
    %c0_19 = arith.constant 0 : index
    %c0_20 = arith.constant 0 : index
    %44 = vector.load %arg8[%c0_19, %c0_20] : memref<1152x128xbf16, #tpu.memory_space<vmem>>, vector<1152x128xbf16>
    %cst_21 = arith.constant dense<0.000000e+00> : vector<128x128xf32>
    %45 = tpu.matmul %43, %44, %cst_21 {dimension_numbers = #tpu.dot_dimension_numbers<[1], [0], [0], [1], [0, 0, 1, 1], [], []>} : vector<128x1152xbf16>, vector<1152x128xbf16>, vector<128x128xf32> -> vector<128x128xf32>
    %c0_22 = arith.constant 0 : index
    %c0_23 = arith.constant 0 : index
    %46 = vector.load %arg9[%c0_22, %c0_23] : memref<1x128xf32, #tpu.memory_space<vmem>>, vector<1x128xf32>
    %47 = vector.broadcast %46 : vector<1x128xf32> to vector<128x128xf32>
    %48 = arith.mulf %45, %47 : vector<128x128xf32>
    %c0_24 = arith.constant 0 : index
    %c0_25 = arith.constant 0 : index
    %49 = vector.load %arg10[%c0_24, %c0_25] : memref<1x128xf32, #tpu.memory_space<vmem>>, vector<1x128xf32>
    %50 = vector.broadcast %49 : vector<1x128xf32> to vector<128x128xf32>
    %51 = arith.addf %48, %50 : vector<128x128xf32>
    %cst_26 = arith.constant 0.000000e+00 : f32
    %52 = vector.broadcast %cst_26 : f32 to vector<128x128xf32>
    %53 = arith.maximumf %51, %52 : vector<128x128xf32>
    %54 = arith.truncf %53 : vector<128x128xf32> to vector<128x128xbf16>
    %c0_27 = arith.constant 0 : index
    %c0_28 = arith.constant 0 : index
    %55 = vector.load %arg11[%c0_27, %c0_28] : memref<128x128xbf16, #tpu.memory_space<vmem>>, vector<128x128xbf16>
    %cst_29 = arith.constant dense<0.000000e+00> : vector<128x128xf32>
    %56 = tpu.matmul %54, %55, %cst_29 {dimension_numbers = #tpu.dot_dimension_numbers<[1], [0], [0], [1], [0, 0, 1, 1], [], []>} : vector<128x128xbf16>, vector<128x128xbf16>, vector<128x128xf32> -> vector<128x128xf32>
    %c0_30 = arith.constant 0 : index
    %c0_31 = arith.constant 0 : index
    %57 = vector.load %arg12[%c0_30, %c0_31] : memref<1x128xf32, #tpu.memory_space<vmem>>, vector<1x128xf32>
    %58 = vector.broadcast %57 : vector<1x128xf32> to vector<128x128xf32>
    %59 = arith.mulf %56, %58 : vector<128x128xf32>
    %c0_32 = arith.constant 0 : index
    %c0_33 = arith.constant 0 : index
    %60 = vector.load %arg13[%c0_32, %c0_33] : memref<1x128xf32, #tpu.memory_space<vmem>>, vector<1x128xf32>
    %61 = vector.broadcast %60 : vector<1x128xf32> to vector<128x128xf32>
    %62 = arith.addf %59, %61 : vector<128x128xf32>
    %63 = arith.extf %1 : vector<128x128xbf16> to vector<128x128xf32>
    %64 = arith.addf %62, %63 : vector<128x128xf32>
    %cst_34 = arith.constant 0.000000e+00 : f32
    %65 = vector.broadcast %cst_34 : f32 to vector<128x128xf32>
    %66 = arith.maximumf %64, %65 : vector<128x128xf32>
    %67 = vector.shape_cast %66 : vector<128x128xf32> to vector<1x8x16x128xf32>
    %68 = arith.truncf %67 : vector<1x8x16x128xf32> to vector<1x8x16x128xbf16>
    %c0_35 = arith.constant 0 : index
    %c0_36 = arith.constant 0 : index
    %c0_37 = arith.constant 0 : index
    %c0_38 = arith.constant 0 : index
    %69 = vector.load %arg14[%c0_35, %c0_36, %c0_37, %c0_38] : memref<1x8x16x128xbf16, #tpu.memory_space<vmem>>, vector<1x8x16x128xbf16>
    tpu.vector_store %arg14[%c0_35, %c0_36, %c0_37, %c0_38], %68 {strides = array<i32>} : memref<1x8x16x128xbf16, #tpu.memory_space<vmem>>, vector<1x8x16x128xbf16>,
    return
  }
  func.func @transform_0(%arg0: i32, %arg1: i32) -> (i32, i32, i32, i32) {
    %c0_i32 = arith.constant 0 : i32
    %c0_i32_0 = arith.constant 0 : i32
    %c0_i32_1 = arith.constant 0 : i32
    return %arg0, %arg1, %c0_i32, %c0_i32_0 : i32, i32, i32, i32
  }
  func.func @transform_1(%arg0: i32, %arg1: i32) -> (i32, i32, i32, i32) {
    %c8_i32 = arith.constant 8 : i32
    %0 = arith.muli %arg1, %c8_i32 : i32
    %c1_i32 = arith.constant 1 : i32
    %1 = arith.subi %0, %c1_i32 : i32
    %c0_i32 = arith.constant 0 : i32
    %2 = arith.maxsi %1, %c0_i32 : i32
    %c0_i32_0 = arith.constant 0 : i32
    %c0_i32_1 = arith.constant 0 : i32
    %c0_i32_2 = arith.constant 0 : i32
    return %arg0, %2, %c0_i32_0, %c0_i32_1 : i32, i32, i32, i32
  }
  func.func @transform_2(%arg0: i32, %arg1: i32) -> (i32, i32, i32, i32) {
    %c1_i32 = arith.constant 1 : i32
    %0 = arith.addi %arg1, %c1_i32 : i32
    %c8_i32 = arith.constant 8 : i32
    %1 = arith.muli %0, %c8_i32 : i32
    %c15_i32 = arith.constant 15 : i32
    %2 = arith.minsi %1, %c15_i32 : i32
    %c0_i32 = arith.constant 0 : i32
    %c0_i32_0 = arith.constant 0 : i32
    %c0_i32_1 = arith.constant 0 : i32
    return %arg0, %2, %c0_i32, %c0_i32_0 : i32, i32, i32, i32
  }
  func.func @transform_3(%arg0: i32, %arg1: i32) -> (i32, i32) {
    %c0_i32 = arith.constant 0 : i32
    %c0_i32_0 = arith.constant 0 : i32
    %c0_i32_1 = arith.constant 0 : i32
    return %c0_i32, %c0_i32_0 : i32, i32
  }
  func.func @transform_4(%arg0: i32, %arg1: i32) -> (i32, i32) {
    %c0_i32 = arith.constant 0 : i32
    %c0_i32_0 = arith.constant 0 : i32
    %c0_i32_1 = arith.constant 0 : i32
    return %c0_i32, %c0_i32_0 : i32, i32
  }
  func.func @transform_5(%arg0: i32, %arg1: i32) -> (i32, i32) {
    %c0_i32 = arith.constant 0 : i32
    %c0_i32_0 = arith.constant 0 : i32
    %c0_i32_1 = arith.constant 0 : i32
    return %c0_i32, %c0_i32_0 : i32, i32
  }
  func.func @transform_6(%arg0: i32, %arg1: i32) -> (i32, i32) {
    %c0_i32 = arith.constant 0 : i32
    %c0_i32_0 = arith.constant 0 : i32
    %c0_i32_1 = arith.constant 0 : i32
    return %c0_i32, %c0_i32_0 : i32, i32
  }
  func.func @transform_7(%arg0: i32, %arg1: i32) -> (i32, i32) {
    %c0_i32 = arith.constant 0 : i32
    %c0_i32_0 = arith.constant 0 : i32
    %c0_i32_1 = arith.constant 0 : i32
    return %c0_i32, %c0_i32_0 : i32, i32
  }
  func.func @transform_8(%arg0: i32, %arg1: i32) -> (i32, i32) {
    %c0_i32 = arith.constant 0 : i32
    %c0_i32_0 = arith.constant 0 : i32
    %c0_i32_1 = arith.constant 0 : i32
    return %c0_i32, %c0_i32_0 : i32, i32
  }
  func.func @transform_9(%arg0: i32, %arg1: i32) -> (i32, i32) {
    %c0_i32 = arith.constant 0 : i32
    %c0_i32_0 = arith.constant 0 : i32
    %c0_i32_1 = arith.constant 0 : i32
    return %c0_i32, %c0_i32_0 : i32, i32
  }
  func.func @transform_10(%arg0: i32, %arg1: i32) -> (i32, i32) {
    %c0_i32 = arith.constant 0 : i32
    %c0_i32_0 = arith.constant 0 : i32
    %c0_i32_1 = arith.constant 0 : i32
    return %c0_i32, %c0_i32_0 : i32, i32
  }
  func.func @transform_11(%arg0: i32, %arg1: i32) -> (i32, i32) {
    %c0_i32 = arith.constant 0 : i32
    %c0_i32_0 = arith.constant 0 : i32
    %c0_i32_1 = arith.constant 0 : i32
    return %c0_i32, %c0_i32_0 : i32, i32
  }
  func.func @transform_12(%arg0: i32, %arg1: i32) -> (i32, i32, i32, i32) {
    %c0_i32 = arith.constant 0 : i32
    %c0_i32_0 = arith.constant 0 : i32
    %c0_i32_1 = arith.constant 0 : i32
    return %arg0, %arg1, %c0_i32, %c0_i32_0 : i32, i32, i32, i32
  }
}

</mosaic_0001>

<bundles_post_ra>
// kernel: bottleneck_forward.1
= control target key start
LH: loop header
LB: loop body
LE: loop exit
PB: predicated region body
PF: predicated region fallthrough
CT: control target
= control target key end

     0   :  { %17 = vsyncpa [#allocation3], 0  ;;  %s4494_s0 = inlined_call_operand.vmem [shape: bf16[2,16,16,128], index: 0, kind: input, shape index: {}, may-alias: {0,1,2}]   ;;  %s4495_s1 = inlined_call_operand.vmem [shape: bf16[2,16,16,128], index: 1, kind: input, shape index: {}, may-alias: {0,1,2}]   ;;  %s4496_s2 = inlined_call_operand.vmem [shape: bf16[2,16,16,128], index: 2, kind: input, shape index: {}, may-alias: {0,1,2}]   ;;  %s4497_s3 = inlined_call_operand.vmem [shape: bf16[128,128], index: 3, kind: input, shape index: {}]   ;;  %s4498_s4 = inlined_call_operand.vmem [shape: f32[1,128], index: 4, kind: input, shape index: {}]   ;;  %s4499_s5 = inlined_call_operand.vmem [shape: f32[1,128], index: 5, kind: input, shape index: {}]   ;;  %s4500_s6 = inlined_call_operand.vmem [shape: bf16[1152,128], index: 6, kind: input, shape index: {}]   ;;  %s4501_s7 = inlined_call_operand.vmem [shape: f32[1,128], index: 7, kind: input, shape index: {}]   ;;  %s4502_s8 = inlined_call_operand.vmem [shape: f32[1,128], index: 8, kind: input, shape index: {}]   ;;  %s4503_s9 = inlined_call_operand.vmem [shape: bf16[128,128], index: 9, kind: input, shape index: {}]   ;;  %s4504_s10 = inlined_call_operand.vmem [shape: f32[1,128], index: 10, kind: input, shape index: {}]   ;;  %s4505_s11 = inlined_call_operand.vmem [shape: f32[1,128], index: 11, kind: input, shape index: {}]   ;;  %s4506_s12 = inlined_call_operand.hbm [shape: bf16[2,16,16,128], index: 12, kind: output, shape index: {}]  }
   0x1   :  { %19 = vsyncpa [#allocation3 + $0x1], 0  ;;  %s3507_s21 = smov 0   ;;  %s3509_s22 = smov 0  }
   0x2   :  { %s3511_s23 = smov 0   ;;  %s3513_s24 = smov 0  }
   0x3   :  { %s3515_s25 = smov 0   ;;  %s3517_s26 = smov 0  }
   0x4   :  { %s3519_s27 = smov 0   ;;  %s3521_s28 = smov 0  }
   0x5 LB: > { %4518 = sst [smem:[#allocation5_spill]] %s3409_s21  ;;  %s2485_s29 = sadd.s32 4294967295, %s3437_s28   ;;  %s3437_s28 = sphi %s3521_s28, %s25_s28   ;;  %s3433_s27 = sphi %s3519_s27, %s4547_s27   ;;  %s3429_s26 = sphi %s3517_s26, %s4546_s26   ;;  %s3425_s25 = sphi %s3515_s25, %s4545_s25   ;;  %s3421_s24 = sphi %s3513_s24, %s4544_s24   ;;  %s3417_s23 = sphi %s3511_s23, %s4543_s23   ;;  %s3413_s22 = sphi %s3509_s22, %s4549_s22   ;;  %s3409_s21 = sphi %s3507_s21, %s4548_s21  }
   0x6   : > { %4519 = sst [smem:[#allocation6_spill]] %s3417_s23  ;;  %s2486_s30 = sadd.s32 4294967294, %s3437_s28  }
   0x7   : > { %4520 = sst [smem:[#allocation7_spill]] %s3429_s26  ;;  %s34_s13 = sadd.s32 1, %s3429_s26 }
   0x8   : > { %4521 = sst [smem:[#allocation8_spill]] %s3433_s27  ;;  %p35_p0 = scmp.ge.s32.totalorder %s34_s13, 2 }
   0x9   : > { %4522 = sst [smem:[#allocation9_spill]] %s3437_s28  ;;  %s37_s14 = sadd.s32 1, %s3433_s27 }
   0xa   : > { %p345_p1 = scmp.ne.s32.totalorder %s3417_s23, %s3413_s22  ;;  %p346_p2 = scmp.eq.s32.totalorder %s2485_s29, 3 }
   0xb   : > { %s4551_s13 = smov (%p35_p0, %s34_s13), 0  ;;  %s4553_s14 = smov (!%p35_p0, %s37_s14), %s3433_s27 }
   0xc   : > { %4523 = sst [smem:[#allocation10_spill]] %s4551_s13  ;;  %s331_s15 = ssub.s32 %s3429_s26, %s4551_s13 }
   0xd   : > { %p3558_p3 = por %p346_p2, %p345_p1  ;;  %p39_p4 = scmp.ge.s32.totalorder %s4553_s14, 2 }
   0xe   : > { %p351_p5 = scmp.ne.s32.totalorder %s3413_s22, %s3409_s21  ;;  %p352_p6 = scmp.eq.s32.totalorder %s2486_s30, 3 }
   0xf   : > { %s4524_s16 = scalar_select %p3558_p3, 1, 0 }
  0x10   : > { %p2495_p7 = scmp.ge.s32.totalorder %s3437_s28, 1  ;;  %s4555_s14 = smov (%p39_p4, %s4553_s14), 0 }
  0x11   : > { %4525 = sst [smem:[#allocation11_spill]] %s4524_s16  ;;  %p3567_p8 = por %p352_p6, %p351_p5 }
  0x12   : > { %4526 = sst [smem:[#allocation12_spill]] %s4555_s14  ;;  %p451_p9 = scmp.lt.s32.totalorder %s3437_s28, 5 }
  0x13   : > { %s4527_s17 = scalar_select %p3567_p8, 1, 0 }
  0x14   : > { %s330_s18 = ssub.s32 %s3433_s27, %s4555_s14  ;;  %s335_s19 = sadd.s32 1, %s3417_s23 }
  0x15   : > { %4528 = sst [smem:[#allocation13_spill]] %s4527_s17  ;;  %s332_s20 = sor.u32 %s331_s15, %s330_s18 }
  0x16   : > { %p452_p10 = pnand %p2495_p7, %p451_p9  ;;  %p333_p11 = scmp.eq.s32.totalorder %s332_s20, 0 }
  0x18   : > { %s3576_s29 = scalar_select %p333_p11, %s3417_s23, %s335_s19  }
  0x19   : > { %455 = sbr.rel (%p452_p10) target bundleno = 862 (0x35e), region = 68 }
  0x1a   : > { %4529 = sst [smem:[#allocation14_spill]] %s3576_s29 }
  0x1e   : > { %v3110_v0 = vld [vmem:[%s4497_s3 + $0x38] sm:$0xff]  ;;  %s3582_s30 = sshll.u32 %s3421_s24, 3  ;;  %v3109_v1 = vld [vmem:[%s4497_s3 + $0x30] sm:$0xff]  ;;  %v3108_v2 = vld [vmem:[%s4497_s3 + $0x28] sm:$0xff]  ;;  %p525_p13 = scmp.lt.s32.totalorder %s3425_s25, 1  ;;  %vm873_vm0 = vcmask 1040384  }
  0x1f   : > { %714 = vmatpush.bf16.msra.mxu0 %v3110_v0  ;;  %s2502_s15 = sadd.s32 4294967295, %s3582_s30  ;;  %v3107_v3 = vld [vmem:[%s4497_s3 + $0x20] sm:$0xff]  ;;  %v3106_v4 = vld [vmem:[%s4497_s3 + $0x18] sm:$0xff]  ;;  %v3105_v5 = vld [vmem:[%s4497_s3 + $0x10] sm:$0xff]  ;;  %p527_p1 = scmp.lt.s32.totalorder %s3582_s30, 15  ;;  %vm934_vm2 = vcmask 1046528  }
  0x20   : > { %p537_p12 = scmp.gt.s32.totalorder %s2502_s15, 0  ;;  %p2503_p0 = scmp.lt.s32.totalorder %s2502_s15, 15  ;;  %v3104_v6 = vld [vmem:[%s4497_s3 + $0x8] sm:$0xff]  ;;  %v3103_v7 = vld [vmem:[%s4497_s3] sm:$0xff]  ;;  %v3126_v14 = vld [vmem:[%s4500_s6 + $0x78] sm:$0xff]  ;;  %vm3439_vm3 = vmmov 1  }
  0x21   : > { %s526_s20 = scalar_select %p525_p13, %s3425_s25, 1  ;;  %v3118_v15 = vld [vmem:[%s4500_s6 + $0x38] sm:$0xff]  ;;  %1650 = vmatpush.bf16.msra.mxu2 %v3126_v14  ;;  %v3125_v17 = vld [vmem:[%s4500_s6 + $0x70] sm:$0xff]  ;;  %v3124_v20 = vld [vmem:[%s4500_s6 + $0x68] sm:$0xff] }
  0x22   : > { %s4557_s15 = smov (!%p537_p12, %s2502_s15), 0  ;;  %s3092_s23 = sadd.s32 8, %s3582_s30  ;;  %v3134_v16 = vld [vmem:[%s4500_s6 + $0xb8] sm:$0xff]  ;;  %1601 = vmatpush.bf16.msra.mxu1 %v3118_v15  ;;  %v3117_v18 = vld [vmem:[%s4500_s6 + $0x30] sm:$0xff]  ;;  %v3116_v21 = vld [vmem:[%s4500_s6 + $0x28] sm:$0xff] }
  0x23   : > { %715 = vmatpush.bf16.msra.mxu0 %v3109_v1  ;;  %s4559_s15 = smov (!%p2503_p0, %s4557_s15), 15  ;;  %s3599_s27 = sshll.u32 %s526_s20, 5  ;;  %1699 = vmatpush.bf16.msra.mxu3 %v3134_v16  ;;  %v3133_v19 = vld [vmem:[%s4500_s6 + $0xb0] sm:$0xff]  ;;  %v3132_v22 = vld [vmem:[%s4500_s6 + $0xa8] sm:$0xff]  ;;  %v3123_v23 = vld [vmem:[%s4500_s6 + $0x60] sm:$0xff] }
  0x24   : > { %s2508_s18 = sshll.u32 %s4559_s15, 1  ;;  %p554_p2 = scmp.lt.s32.totalorder %s3092_s23, 15  ;;  %v3115_v25 = vld [vmem:[%s4500_s6 + $0x20] sm:$0xff]  ;;  %v3122_v27 = vld [vmem:[%s4500_s6 + $0x58] sm:$0xff]  ;;  %v3121_v30 = vld [vmem:[%s4500_s6 + $0x50] sm:$0xff] }
  0x25   : > { %s545_s26 = sadd.s32 %s2508_s18, %s3599_s27  ;;  %1651 = vmatpush.bf16.msra.mxu2 %v3125_v17  ;;  %v3131_v26 = vld [vmem:[%s4500_s6 + $0xa0] sm:$0xff]  ;;  %v3114_v28 = vld [vmem:[%s4500_s6 + $0x18] sm:$0xff]  ;;  %v3113_v31 = vld [vmem:[%s4500_s6 + $0x10] sm:$0xff]  ;;  %p841_p4 = scmp.gt.s32.totalorder %s3421_s24, 0 }
  0x26   : > { %s2510_s21 = sshll.u32 %s545_s26, 2  ;;  %s4561_s23 = smov (!%p554_p2, %s3092_s23), 15  ;;  %1602 = vmatpush.bf16.msra.mxu1 %v3117_v18  ;;  %v3130_v29 = vld [vmem:[%s4500_s6 + $0x98] sm:$0xff]  ;;  %v3129_v32 = vld [vmem:[%s4500_s6 + $0x90] sm:$0xff]  ;;  %v3120_v33 = vld [vmem:[%s4500_s6 + $0x48] sm:$0xff] }
  0x27   : > { %716 = vmatpush.bf16.msra.mxu0 %v3108_v2  ;;  %s547_s29 = scalar_lea.vmem %s4495_s1, %s2510_s21  ;;  %s4563_s23 = smov (!%p554_p2, %s4561_s23), 15  ;;  %1700 = vmatpush.bf16.msra.mxu3 %v3133_v19  ;;  %v3112_v34 = vld [vmem:[%s4500_s6 + $0x8] sm:$0xff]  ;;  %v3119_v36 = vld [vmem:[%s4500_s6 + $0x40] sm:$0xff]  ;;  %v3166_v40 = vld [vmem:[%s4500_s6 + $0x1b8] sm:$0xff] }
  0x28   : > { %s528_s19 = scalar_select %p527_p1, %s3582_s30, 15  ;;  %v3101_v8 = vld [vmem:[%s547_s29] sm:$0xff]  ;;  %v3128_v35 = vld [vmem:[%s4500_s6 + $0x88] sm:$0xff]  ;;  %v3150_v41 = vld [vmem:[%s4500_s6 + $0x138] sm:$0xff] }
  0x29   : > { %s3623_s21 = sshll.u32 %s4563_s23, 1  ;;  %1652 = vmatpush.bf16.msra.mxu2 %v3124_v20  ;;  %v3111_v38 = vld [vmem:[%s4500_s6] sm:$0xff]  ;;  %v3142_v42 = vld [vmem:[%s4500_s6 + $0xf8] sm:$0xff]  ;;  %v3165_v43 = vld [vmem:[%s4500_s6 + $0x1b0] sm:$0xff]  ;;  %p844_p5 = scmp.lt.s32.totalorder %s3421_s24, 1 }
  0x2a   : > { %s2498_s18 = sshll.u32 %s528_s19, 1  ;;  %s562_s14 = sadd.s32 %s3623_s21, %s3599_s27  ;;  %1603 = vmatpush.bf16.msra.mxu1 %v3116_v21  ;;  %v3127_v39 = vld [vmem:[%s4500_s6 + $0x80] sm:$0xff]  ;;  %v3164_v44 = vld [vmem:[%s4500_s6 + $0x1a8] sm:$0xff]  ;;  %v3162_v51 = vld [vmem:[%s4500_s6 + $0x198] sm:$0xff] }
  0x2b   : > { %717 = vmatpush.bf16.msra.mxu0 %v3107_v3  ;;  %s531_s28 = sadd.s32 %s3599_s27, %s2498_s18  ;;  %1701 = vmatpush.bf16.msra.mxu3 %v3132_v22  ;;  %v3724_v45 = vld [vmem:[%s4498_s4] ss:$0 sm:$0xff]  ;;  %v3149_v53 = vld [vmem:[%s4500_s6 + $0x130] sm:$0xff]  ;;  %s2517_s23 = sshll.u32 %s562_s14, 2  ;;  %v3160_v61 = vld [vmem:[%s4500_s6 + $0x188] sm:$0xff] }
  0x2c   : > { %s2500_s26 = sshll.u32 %s531_s28, 2  ;;  %v3163_v47 = vld [vmem:[%s4500_s6 + $0x1a0] sm:$0xff]  ;;  %v3141_v54 = vld [vmem:[%s4500_s6 + $0xf0] sm:$0xff]  ;;  %s564_s15 = scalar_lea.vmem %s4496_s2, %s2517_s23  ;;  %vm2878_vm1 = vmneg %vm873_vm0 }
  0x2d   : > { %s3621_s20 = scalar_lea.vmem %s4494_s0, %s2500_s26  ;;  %1653 = vmatpush.bf16.msra.mxu2 %v3123_v23  ;;  %v3734_v49 = vld [vmem:[%s4499_s5] ss:$0 sm:$0xff]  ;;  %v3161_v55 = vld [vmem:[%s4500_s6 + $0x190] sm:$0xff]  ;;  %vm3765_vm4 = vmpackc.low %vm3439_vm3, %vm2878_vm1  ;;  %s521_s14 = sand.u32 1, %s3413_s22  }
  0x2e   : > { %v3093_v9 = vld [vmem:[%s3621_s20] sm:$0xff]  ;;  %v3094_v10 = vld [vmem:[%s3621_s20 + $0x8] sm:$0xff]  ;;  %v3095_v11 = vld [vmem:[%s3621_s20 + $0x10] sm:$0xff]  ;;  %1604 = vmatpush.bf16.msra.mxu1 %v3115_v25  ;;  %s842_s26 = scalar_select %p841_p4, 1, 0 }
  0x2f   : > { %718 = vmatpush.bf16.msra.mxu0 %v3106_v4  ;;  %v3096_v12 = vld [vmem:[%s3621_s20 + $0x18] sm:$0xff]  ;;  %v3097_v13 = vld [vmem:[%s3621_s20 + $0x20] sm:$0xff]  ;;  %v3098_v24 = vld [vmem:[%s3621_s20 + $0x28] sm:$0xff]  ;;  %1702 = vmatpush.bf16.msra.mxu3 %v3131_v26  ;;  %s845_s23 = scalar_select %p844_p5, 1, 0 }
  0x30   : > { %v3099_v37 = vld [vmem:[%s3621_s20 + $0x30] sm:$0xff]  ;;  %v3100_v46 = vld [vmem:[%s3621_s20 + $0x38] sm:$0xff]  ;;  %s843_s16 = scvt.s32.f32 %s842_s26  ;;  %v3102_v0 = vld [vmem:[%s564_s15] sm:$0xff]  ;;  %s3191_s29 = sshll.u32 %s3421_s24, 4 }
  0x31   : > { %1654 = vmatpush.bf16.msra.mxu2 %v3122_v27  ;;  %v3159_v2 = vld [vmem:[%s4500_s6 + $0x180] sm:$0xff]  ;;  %vm3773_vm5 = vmpackc.low %vm934_vm2, %vm3439_vm3  ;;  %v3148_v17 = vld [vmem:[%s4500_s6 + $0x128] sm:$0xff]  ;;  %s846_s28 = scvt.s32.f32 %s845_s23  ;;  %s3081_s19 = sshll.u32 %s3425_s25, 5 }
  0x32   : > { %1605 = vmatpush.bf16.msra.mxu1 %v3114_v28  ;;  %v847_v58 = vstv %s843_s16  ;;  %v3140_v18 = vld [vmem:[%s4500_s6 + $0xe8] sm:$0xff]  ;;  %s2496_s16 = sshll.u32 %s521_s14, 6  ;;  %s2352_s18 = sadd.s32 %s3191_s29, %s3081_s19 }
  0x33   : > { %719 = vmatpush.bf16.msra.mxu0 %v3105_v5  ;;  %1703 = vmatpush.bf16.msra.mxu3 %v3130_v29  ;;  %s4390_s17 = scalar_lea.vmem [#allocation2], %s2496_s16  ;;  %s3082_s23 = sshll.u32 %s2352_s18, 2 }
  0x34   : > { %s2354_s24 = scalar_lea.hbm %s4506_s12, %s3082_s23  ;;  %s2340_s30 = scalar_lea.sflag [#allocation3], %s521_s14 }
  0x35   : > { %1655 = vmatpush.bf16.msra.mxu2 %v3121_v30  ;;  %s3363_s29 = scalar_lea.hbm %s4506_s12, 256 }
  0x36   : > { %1606 = vmatpush.bf16.msra.mxu1 %v3113_v31 }
  0x37   : > { %720 = vmatpush.bf16.msra.mxu0 %v3104_v6  ;;  %1704 = vmatpush.bf16.msra.mxu3 %v3129_v32 }
  0x39   : > { %1656 = vmatpush.bf16.msra.mxu2 %v3120_v33 }
  0x3a   : > { %1607 = vmatpush.bf16.msra.mxu1 %v3112_v34 }
  0x3b   : > { %721 = vmatpush.bf16.msra.mxu0 %v3103_v7  ;;  %1705 = vmatpush.bf16.msra.mxu3 %v3128_v35 }
  0x3d   : > { %1657 = vmatpush.bf16.msra.mxu2 %v3119_v36  ;;  %v3147_v36 = vld [vmem:[%s4500_s6 + $0x120] sm:$0xff] }
  0x3e   : > { %722 = vmatmul.bf16.vlgmr.msra.gmra.mxu0 %v3101_v8  ;;  %1608 = vmatpush.bf16.msra.mxu1 %v3111_v38 }
  0x3f   : > { %1706 = vmatpush.bf16.msra.mxu3 %v3127_v39  ;;  %1895 = vmatpush.bf16.msrb.mxu0 %v3166_v40 }
  0x41   : > { %1797 = vmatpush.bf16.msrb.mxu2 %v3150_v41 }
  0x42   : > { %1748 = vmatpush.bf16.msrb.mxu1 %v3142_v42 }
  0x43   : > { %1896 = vmatpush.bf16.msrb.mxu0 %v3165_v43 }
  0x45   : > { %1798 = vmatpush.bf16.msrb.mxu2 %v3149_v53 }
  0x46   : > { %1749 = vmatpush.bf16.msrb.mxu1 %v3141_v54 }
  0x47   : > { %1897 = vmatpush.bf16.msrb.mxu0 %v3164_v44 }
  0x49   : > { %1799 = vmatpush.bf16.msrb.mxu2 %v3148_v17 }
  0x4a   : > { %1750 = vmatpush.bf16.msrb.mxu1 %v3140_v18 }
  0x4b   : > { %1898 = vmatpush.bf16.msrb.mxu0 %v3163_v47 }
  0x4d   : > { %1800 = vmatpush.bf16.msrb.mxu2 %v3147_v36 }
  0x4e   : > { %727 = vmatmul.bf16.gmra.mxu0 %v3093_v9 }
  0x4f   : > { %1899 = vmatpush.bf16.msrb.mxu0 %v3162_v51 }
  0x53   : > { %1900 = vmatpush.bf16.msrb.mxu0 %v3161_v55 }
  0x57   : > { %1901 = vmatpush.bf16.msrb.mxu0 %v3160_v61 }
  0x5b   : > { %1902 = vmatpush.bf16.msrb.mxu0 %v3159_v2 }
  0x5e   : > { %732 = vmatmul.bf16.gmra.mxu0 %v3094_v10 }
  0x6e   : > { %737 = vmatmul.bf16.gmra.mxu0 %v3095_v11 }
  0x7e   : > { %742 = vmatmul.bf16.gmra.mxu0 %v3096_v12 }
  0x8e   : > { %747 = vmatmul.bf16.gmra.mxu0 %v3097_v13 }
  0x9e   : > { %752 = vmatmul.bf16.gmra.mxu0 %v3098_v24 }
  0xae   : > { %757 = vmatmul.bf16.gmra.mxu0 %v3099_v37  ;;  %v3139_v37 = vld [vmem:[%s4500_s6 + $0xe0] sm:$0xff] }
  0xaf   : > { %1751 = vmatpush.bf16.msrb.mxu1 %v3139_v37  ;;  %v3144_v37 = vld [vmem:[%s4500_s6 + $0x108] sm:$0xff] }
  0xbb   : > { %v723_v48 = vpop.f32.mrf.mxu0 }
  0xbc   : > { %v777_v50 = vmul.f32 %v3724_v45, %v723_v48 }
  0xbe   : > { %762 = vmatmul.bf16.gmra.mxu0 %v3100_v46  ;;  %v801_v52 = vadd.f32 %v3734_v49, %v777_v50 }
  0xc0   : > { %v821_v56 = vmax.f32 %v801_v52, 0.0 }
  0xc2   : > { %v848_v62 = vmul.f32 %v847_v58, %v821_v56 }
  0xc3   : > { %v725_v57 = vpop.f32.mrf.mxu0 }
  0xc4   : > { %v778_v59 = vmul.f32 %v3724_v45, %v725_v57  ;;  %v874_v4 = vrot.slane %v848_v62, 7  ;;  %v935_v7 = vrot.slane %v848_v62, 1  ;;  %v3146_v57 = vld [vmem:[%s4500_s6 + $0x118] sm:$0xff] }
  0xc5   : > { %1801 = vmatpush.bf16.msrb.mxu2 %v3146_v57 }
  0xc6   : > { %v802_v60 = vadd.f32 %v3734_v49, %v778_v59 }
  0xc8   : > { %v822_v63 = vmax.f32 %v802_v60, 0.0 }
  0xca   : > { %v849_v1 = vmul.f32 %v847_v58, %v822_v63  ;;  %v3138_v58 = vld [vmem:[%s4500_s6 + $0xd8] sm:$0xff] }
  0xcb   : > { %v728_v3 = vpop.f32.mrf.mxu0  ;;  %1752 = vmatpush.bf16.msrb.mxu1 %v3138_v58 }
  0xcc   : > { %v996_v5 = vpack.c.bf16 %v849_v1, %v848_v62  ;;  %v875_v6 = vrot.slane %v849_v1, 7  ;;  %v936_v8 = vrot.slane %v849_v1, 1  ;;  %v779_v10 = vmul.f32 %v3724_v45, %v728_v3 }
  0xce   : > { %767 = vmatmul.bf16.gmra.mxu0 %v3102_v0  ;;  %1658 = vmatmul.bf16.vlgmr.msra.gmra.mxu2 %v996_v5  ;;  %v876_v11 = vsel %vm873_vm0, %v874_v4, %v875_v6  ;;  %v937_v12 = vsel %vm934_vm2, %v935_v7, %v936_v8  ;;  %v803_v16 = vadd.f32 %v3734_v49, %v779_v10 }
  0xcf   : > { %v2880_v14 = vpack.c.bf16 %v876_v11, %v874_v4  ;;  %v2911_v15 = vpack.c.bf16 %v936_v8, %v937_v12 }
  0xd0   : > { %v823_v21 = vmax.f32 %v803_v16, 0.0 }
  0xd1   : > { %2881 = vmatmul.msk.bf16.vlgmr.msra.gmra.mxu1 %vm3765_vm4, %v2880_v14  ;;  %2912 = vmatmul.msk.bf16.vlgmr.msra.gmra.mxu3 %vm3773_vm5, %v2911_v15  ;;  %v3145_v14 = vld [vmem:[%s4500_s6 + $0x110] sm:$0xff] }
  0xd2   : > { %v938_v24 = vrot.slane %v823_v21, 1  ;;  %v877_v26 = vrot.slane %v823_v21, 7  ;;  %v3137_v15 = vld [vmem:[%s4500_s6 + $0xd0] sm:$0xff]  ;;  %1802 = vmatpush.bf16.msrb.mxu2 %v3145_v14 }
  0xd3   : > { %v730_v19 = vpop.f32.mrf.mxu0  ;;  %1753 = vmatpush.bf16.msrb.mxu1 %v3137_v15  ;;  %v3173_v14 = vld [vmem:[%s4500_s6 + $0x1f0] sm:$0xff] }
  0xd4   : > { %v780_v20 = vmul.f32 %v3724_v45, %v730_v19 }
  0xd6   : > { %v804_v22 = vadd.f32 %v3734_v49, %v780_v20  ;;  %1803 = vmatpush.bf16.msrb.mxu2 %v3144_v37 }
  0xd8   : > { %v824_v23 = vmax.f32 %v804_v22, 0.0 }
  0xda   : > { %v878_v25 = vrot.slane %v824_v23, 7  ;;  %v939_v27 = vrot.slane %v824_v23, 1  ;;  %v3790_v29 = vpack.c.bf16 %v824_v23, %v823_v21 }
  0xdb   : > { %v733_v28 = vpop.f32.mrf.mxu0 }
  0xdc   : > { %v879_v30 = vsel %vm873_vm0, %v877_v26, %v878_v25  ;;  %v940_v31 = vsel %vm934_vm2, %v938_v24, %v939_v27  ;;  %v781_v32 = vmul.f32 %v3724_v45, %v733_v28 }
  0xdd   : > { %v3796_v33 = vpack.c.bf16 %v879_v30, %v877_v26  ;;  %v3798_v34 = vpack.c.bf16 %v939_v27, %v940_v31 }
  0xde   : > { %1663 = vmatmul.bf16.gmra.mxu2 %v3790_v29  ;;  %v805_v35 = vadd.f32 %v3734_v49, %v781_v32 }
  0xe0   : > { %v825_v40 = vmax.f32 %v805_v35, 0.0  ;;  %v3158_v35 = vld [vmem:[%s4500_s6 + $0x178] sm:$0xff] }
  0xe1   : > { %2885 = vmatmul.msk.bf16.gmra.mxu1 %vm3765_vm4, %v3796_v33  ;;  %2915 = vmatmul.msk.bf16.gmra.mxu3 %vm3773_vm5, %v3798_v34 }
  0xe2   : > { %v880_v43 = vrot.slane %v825_v40, 7  ;;  %v941_v44 = vrot.slane %v825_v40, 1  ;;  %1846 = vmatpush.bf16.msrb.mxu3 %v3158_v35 }
  0xe3   : > { %v735_v38 = vpop.f32.mrf.mxu0 }
  0xe4   : > { %v782_v39 = vmul.f32 %v3724_v45, %v735_v38  ;;  %v3136_v38 = vld [vmem:[%s4500_s6 + $0xc8] sm:$0xff] }
  0xe5   : > { %1754 = vmatpush.bf16.msrb.mxu1 %v3136_v38 }
  0xe6   : > { %v806_v41 = vadd.f32 %v3734_v49, %v782_v39 }
  0xe8   : > { %v826_v42 = vmax.f32 %v806_v41, 0.0  ;;  %v3157_v41 = vld [vmem:[%s4500_s6 + $0x170] sm:$0xff] }
  0xe9   : > { %1847 = vmatpush.bf16.msrb.mxu3 %v3157_v41  ;;  %v3182_v41 = vld [vmem:[%s4500_s6 + $0x238] sm:$0xff] }
  0xea   : > { %v881_v46 = vrot.slane %v826_v42, 7  ;;  %v942_v47 = vrot.slane %v826_v42, 1  ;;  %v3815_v50 = vpack.c.bf16 %v826_v42, %v825_v40 }
  0xeb   : > { %v738_v48 = vpop.f32.mrf.mxu0 }
  0xec   : > { %v882_v51 = vsel %vm873_vm0, %v880_v43, %v881_v46  ;;  %v943_v52 = vsel %vm934_vm2, %v941_v44, %v942_v47  ;;  %v783_v54 = vmul.f32 %v3724_v45, %v738_v48  ;;  %v3156_v46 = vld [vmem:[%s4500_s6 + $0x168] sm:$0xff] }
  0xed   : > { %v3819_v53 = vpack.c.bf16 %v882_v51, %v880_v43  ;;  %v3826_v55 = vpack.c.bf16 %v942_v47, %v943_v52  ;;  %1848 = vmatpush.bf16.msrb.mxu3 %v3156_v46 }
  0xee   : > { %1668 = vmatmul.bf16.gmra.mxu2 %v3815_v50  ;;  %v807_v56 = vadd.f32 %v3734_v49, %v783_v54 }
  0xef   : > { %2993 = vmatmul.msk.bf16.vlgmr.msrb.gmra.mxu0 %vm3765_vm4, %v3819_v53 }
  0xf0   : > { %v827_v61 = vmax.f32 %v807_v56, 0.0 }
  0xf1   : > { %2889 = vmatmul.msk.bf16.gmra.mxu1 %vm3765_vm4, %v3819_v53  ;;  %2918 = vmatmul.msk.bf16.gmra.mxu3 %vm3773_vm5, %v3826_v55 }
  0xf2   : > { %v944_v0 = vrot.slane %v827_v61, 1  ;;  %v883_v2 = vrot.slane %v827_v61, 7 }
  0xf3   : > { %v740_v59 = vpop.f32.mrf.mxu0 }
  0xf4   : > { %v784_v60 = vmul.f32 %v3724_v45, %v740_v59  ;;  %v3155_v59 = vld [vmem:[%s4500_s6 + $0x160] sm:$0xff] }
  0xf5   : > { %1849 = vmatpush.bf16.msrb.mxu3 %v3155_v59 }
  0xf6   : > { %v808_v62 = vadd.f32 %v3734_v49, %v784_v60 }
  0xf8   : > { %v828_v63 = vmax.f32 %v808_v62, 0.0 }
  0xfa   : > { %v884_v1 = vrot.slane %v828_v63, 7  ;;  %v945_v3 = vrot.slane %v828_v63, 1  ;;  %v3843_v5 = vpack.c.bf16 %v828_v63, %v827_v61  ;;  %v3154_v63 = vld [vmem:[%s4500_s6 + $0x158] sm:$0xff] }
  0xfb   : > { %v743_v4 = vpop.f32.mrf.mxu0  ;;  %1850 = vmatpush.bf16.msrb.mxu3 %v3154_v63 }
  0xfc   : > { %v885_v6 = vsel %vm873_vm0, %v883_v2, %v884_v1  ;;  %v946_v7 = vsel %vm934_vm2, %v944_v0, %v945_v3  ;;  %v785_v10 = vmul.f32 %v3724_v45, %v743_v4  ;;  %v3143_v1 = vld [vmem:[%s4500_s6 + $0x100] sm:$0xff]  ;;  %v3174_v4 = vld [vmem:[%s4500_s6 + $0x1f8] sm:$0xff] }
  0xfd   : > { %v3847_v8 = vpack.c.bf16 %v885_v6, %v883_v2  ;;  %v3854_v11 = vpack.c.bf16 %v945_v3, %v946_v7  ;;  %v3135_v2 = vld [vmem:[%s4500_s6 + $0xc0] sm:$0xff]  ;;  %1804 = vmatpush.bf16.msrb.mxu2 %v3143_v1  ;;  %v3153_v7 = vld [vmem:[%s4500_s6 + $0x150] sm:$0xff]  ;;  %1944 = vmatpush.bf16.msra.mxu0 %v3174_v4 }
  0xfe   : > { %1673 = vmatmul.bf16.gmra.mxu2 %v3843_v5  ;;  %v809_v12 = vadd.f32 %v3734_v49, %v785_v10  ;;  %1755 = vmatpush.bf16.msrb.mxu1 %v3135_v2  ;;  %v3181_v1 = vld [vmem:[%s4500_s6 + $0x230] sm:$0xff] }
  0xff   : > { %2997 = vmatmul.msk.bf16.gmra.mxu0 %vm3765_vm4, %v3847_v8  ;;  %1851 = vmatpush.bf16.msrb.mxu3 %v3153_v7 }
 0x100   : > { %v829_v18 = vmax.f32 %v809_v12, 0.0 }
 0x101   : > { %2893 = vmatmul.msk.bf16.gmra.mxu1 %vm3765_vm4, %v3847_v8  ;;  %2921 = vmatmul.msk.bf16.gmra.mxu3 %vm3773_vm5, %v3854_v11 }
 0x102   : > { %v886_v21 = vrot.slane %v829_v18, 7  ;;  %v947_v22 = vrot.slane %v829_v18, 1  ;;  %3239 = vmatpush.bf16.msra.mxu1 %v3174_v4  ;;  %1945 = vmatpush.bf16.msra.mxu0 %v3173_v14  ;;  %v3167_v4 = vld [vmem:[%s4500_s6 + $0x1c0] sm:$0xff] }
 0x103   : > { %v745_v16 = vpop.f32.mrf.mxu0  ;;  %3247 = vmatpush.bf16.msra.mxu2 %v3182_v41 }
 0x104   : > { %v786_v17 = vmul.f32 %v3724_v45, %v745_v16  ;;  %v3152_v16 = vld [vmem:[%s4500_s6 + $0x148] sm:$0xff] }
 0x105   : > { %1852 = vmatpush.bf16.msrb.mxu3 %v3152_v16  ;;  %v3180_v16 = vld [vmem:[%s4500_s6 + $0x228] sm:$0xff] }
 0x106   : > { %v810_v19 = vadd.f32 %v3734_v49, %v786_v17  ;;  %3240 = vmatpush.bf16.msra.mxu1 %v3173_v14 }
 0x107   : > { %3248 = vmatpush.bf16.msra.mxu2 %v3181_v1 }
 0x108   : > { %v830_v20 = vmax.f32 %v810_v19, 0.0 }
 0x10a   : > { %v887_v23 = vrot.slane %v830_v20, 7  ;;  %v948_v24 = vrot.slane %v830_v20, 1  ;;  %v3871_v26 = vpack.c.bf16 %v830_v20, %v829_v18 }
 0x10b   : > { %v748_v25 = vpop.f32.mrf.mxu0  ;;  %3249 = vmatpush.bf16.msra.mxu2 %v3180_v16 }
 0x10c   : > { %v888_v27 = vsel %vm873_vm0, %v886_v21, %v887_v23  ;;  %v949_v28 = vsel %vm934_vm2, %v947_v22, %v948_v24  ;;  %v787_v31 = vmul.f32 %v3724_v45, %v748_v25  ;;  %v3172_v22 = vld [vmem:[%s4500_s6 + $0x1e8] sm:$0xff] }
 0x10d   : > { %v3875_v30 = vpack.c.bf16 %v888_v27, %v886_v21  ;;  %v3882_v32 = vpack.c.bf16 %v948_v24, %v949_v28  ;;  %v3151_v27 = vld [vmem:[%s4500_s6 + $0x140] sm:$0xff]  ;;  %1946 = vmatpush.bf16.msra.mxu0 %v3172_v22  ;;  %3241 = vmatpush.bf16.msra.mxu1 %v3172_v22 }
 0x10e   : > { %1678 = vmatmul.bf16.gmra.mxu2 %v3871_v26  ;;  %v811_v36 = vadd.f32 %v3734_v49, %v787_v31  ;;  %1853 = vmatpush.bf16.msrb.mxu3 %v3151_v27  ;;  %v3179_v22 = vld [vmem:[%s4500_s6 + $0x220] sm:$0xff] }
 0x10f   : > { %3001 = vmatmul.msk.bf16.gmra.mxu0 %vm3765_vm4, %v3875_v30  ;;  %3250 = vmatpush.bf16.msra.mxu2 %v3179_v22 }
 0x110   : > { %v831_v42 = vmax.f32 %v811_v36, 0.0  ;;  %v3171_v36 = vld [vmem:[%s4500_s6 + $0x1e0] sm:$0xff] }
 0x111   : > { %2897 = vmatmul.msk.bf16.gmra.mxu1 %vm3765_vm4, %v3875_v30  ;;  %2924 = vmatmul.msk.bf16.gmra.mxu3 %vm3773_vm5, %v3882_v32 }
 0x112   : > { %v889_v47 = vrot.slane %v831_v42, 7  ;;  %v950_v48 = vrot.slane %v831_v42, 1  ;;  %1947 = vmatpush.bf16.msra.mxu0 %v3171_v36  ;;  %3242 = vmatpush.bf16.msra.mxu1 %v3171_v36 }
 0x113   : > { %v750_v39 = vpop.f32.mrf.mxu0 }
 0x114   : > { %v788_v40 = vmul.f32 %v3724_v45, %v750_v39  ;;  %v3170_v39 = vld [vmem:[%s4500_s6 + $0x1d8] sm:$0xff] }
 0x116   : > { %v812_v43 = vadd.f32 %v3734_v49, %v788_v40  ;;  %1948 = vmatpush.bf16.msra.mxu0 %v3170_v39  ;;  %3243 = vmatpush.bf16.msra.mxu1 %v3170_v39 }
 0x118   : > { %v832_v44 = vmax.f32 %v812_v43, 0.0 }
 0x11a   : > { %v890_v51 = vrot.slane %v832_v44, 7  ;;  %v951_v52 = vrot.slane %v832_v44, 1  ;;  %v3908_v56 = vpack.c.bf16 %v832_v44, %v831_v42  ;;  %v3169_v44 = vld [vmem:[%s4500_s6 + $0x1d0] sm:$0xff] }
 0x11b   : > { %v753_v54 = vpop.f32.mrf.mxu0  ;;  %1949 = vmatpush.bf16.msra.mxu0 %v3169_v44  ;;  %3244 = vmatpush.bf16.msra.mxu1 %v3169_v44 }
 0x11c   : > { %v891_v57 = vsel %vm873_vm0, %v889_v47, %v890_v51  ;;  %v952_v58 = vsel %vm934_vm2, %v950_v48, %v951_v52  ;;  %v789_v61 = vmul.f32 %v3724_v45, %v753_v54 }
 0x11d   : > { %v3915_v60 = vpack.c.bf16 %v891_v57, %v889_v47  ;;  %v3922_v62 = vpack.c.bf16 %v951_v52, %v952_v58  ;;  %v3168_v57 = vld [vmem:[%s4500_s6 + $0x1c8] sm:$0xff] }
 0x11e   : > { %1683 = vmatmul.bf16.gmra.mxu2 %v3908_v56  ;;  %v813_v0 = vadd.f32 %v3734_v49, %v789_v61 }
 0x11f   : > { %3005 = vmatmul.msk.bf16.gmra.mxu0 %vm3765_vm4, %v3915_v60  ;;  %3245 = vmatpush.bf16.msra.mxu1 %v3168_v57 }
 0x120   : > { %v833_v10 = vmax.f32 %v813_v0, 0.0  ;;  %1950 = vmatpush.bf16.msra.mxu0 %v3168_v57  ;;  %v3175_v57 = vld [vmem:[%s4500_s6 + $0x200] sm:$0xff] }
 0x121   : > { %2901 = vmatmul.msk.bf16.gmra.mxu1 %vm3765_vm4, %v3915_v60  ;;  %2927 = vmatmul.msk.bf16.gmra.mxu3 %vm3773_vm5, %v3922_v62 }
 0x122   : > { %v892_v17 = vrot.slane %v833_v10, 7  ;;  %v953_v18 = vrot.slane %v833_v10, 1 }
 0x123   : > { %v755_v3 = vpop.f32.mrf.mxu0  ;;  %3246 = vmatpush.bf16.msra.mxu1 %v3167_v4 }
 0x124   : > { %v790_v6 = vmul.f32 %v3724_v45, %v755_v3  ;;  %1951 = vmatpush.bf16.msra.mxu0 %v3167_v4 }
 0x126   : > { %v814_v12 = vadd.f32 %v3734_v49, %v790_v6 }
 0x128   : > { %v834_v15 = vmax.f32 %v814_v12, 0.0  ;;  %1993 = vmatpush.bf16.msrb.mxu0 %v3182_v41 }
 0x12a   : > { %v893_v19 = vrot.slane %v834_v15, 7  ;;  %v954_v20 = vrot.slane %v834_v15, 1  ;;  %v3957_v23 = vpack.c.bf16 %v834_v15, %v833_v10 }
 0x12b   : > { %v758_v21 = vpop.f32.mrf.mxu0 }
 0x12c   : > { %v894_v24 = vsel %vm873_vm0, %v892_v17, %v893_v19  ;;  %v955_v25 = vsel %vm934_vm2, %v953_v18, %v954_v20  ;;  %v791_v31 = vmul.f32 %v3724_v45, %v758_v21  ;;  %1994 = vmatpush.bf16.msrb.mxu0 %v3181_v1 }
 0x12d   : > { %v3964_v28 = vpack.c.bf16 %v894_v24, %v892_v17  ;;  %v3971_v35 = vpack.c.bf16 %v954_v20, %v955_v25 }
 0x12e   : > { %1688 = vmatmul.bf16.gmra.mxu2 %v3957_v23  ;;  %v815_v37 = vadd.f32 %v3734_v49, %v791_v31 }
 0x12f   : > { %3009 = vmatmul.msk.bf16.gmra.mxu0 %vm3765_vm4, %v3964_v28 }
 0x130   : > { %v835_v42 = vmax.f32 %v815_v37, 0.0  ;;  %1995 = vmatpush.bf16.msrb.mxu0 %v3180_v16  ;;  %v850_v37 = vstv %s846_s28  ;;  %s2357_s28 = sshll.u32 %s2354_s24, 4  ;;  %s2358_s28 = int_to_ptr.hbm [resolvable:$true] %s2357_s28 }
 0x131   : > { %2905 = vmatmul.msk.bf16.gmra.mxu1 %vm3765_vm4, %v3964_v28  ;;  %2930 = vmatmul.msk.bf16.gmra.mxu3 %vm3773_vm5, %v3971_v35  ;;  %s3357_s15 = sshra.s32 %s2358_s28, 4  ;;  %s3358_s15 = int_to_ptr.hbm [resolvable:$true] %s3357_s15 }
 0x132   : > { %v895_v47 = vrot.slane %v835_v42, 7  ;;  %v956_v48 = vrot.slane %v835_v42, 1  ;;  %s3359_s27 = scalar_lea.hbm %s3358_s15, 64  ;;  %p3364_p10 = scmp.lt.s32.totalorder %s3358_s15, %s4506_s12 }
 0x133   : > { %v760_v38 = vpop.f32.mrf.mxu0  ;;  %p3360_p6 = scmp.ne.s32.totalorder %s3358_s15, %s3359_s27  ;;  %p3365_p11 = scmp.lt.s32.totalorder %s3363_s29, %s3359_s27 }
 0x134   : > { %v792_v40 = vmul.f32 %v3724_v45, %v760_v38  ;;  %1996 = vmatpush.bf16.msrb.mxu0 %v3179_v22 }
 0x135   : > { %p3361_p7 = pnand %p3360_p6, %p3558_p3  ;;  %p3366_p12 = por %p3365_p11, %p3364_p10 }
 0x136   : > { %v816_v43 = vadd.f32 %v3734_v49, %v792_v40 }
 0x137   : > { %p3362_p9 = pneg %p3361_p7 }
 0x138   : > { %v836_v46 = vmax.f32 %v816_v43, 0.0 }
 0x139   : > { %p3367_p13 = pnand %p3366_p12, %p3362_p9 }
 0x13a   : > { %v896_v51 = vrot.slane %v836_v46, 7  ;;  %v957_v52 = vrot.slane %v836_v46, 1  ;;  %v3998_v59 = vpack.c.bf16 %v836_v46, %v835_v42 }
 0x13b   : > { %v763_v54 = vpop.f32.mrf.mxu0 }
 0x13c   : > { %v793_v58 = vmul.f32 %v3724_v45, %v763_v54  ;;  %v897_v61 = vsel %vm873_vm0, %v895_v47, %v896_v51  ;;  %v958_v63 = vsel %vm934_vm2, %v956_v48, %v957_v52 }
 0x13d   : > { %v4002_v0 = vpack.c.bf16 %v897_v61, %v895_v47  ;;  %v4011_v2 = vpack.c.bf16 %v957_v52, %v958_v63 }
 0x13e   : > { %1693 = vmatmul.bf16.gmra.mxu2 %v3998_v59  ;;  %v817_v3 = vadd.f32 %v3734_v49, %v793_v58 }
 0x13f   : > { %3013 = vmatmul.msk.bf16.gmra.mxu0 %vm3765_vm4, %v4002_v0 }
 0x140   : > { %v4023_v7 = vmax.f32 %v817_v3, 0.0 }
 0x141   : > { %2909 = vmatmul.msk.bf16.gmra.mxu1 %vm3765_vm4, %v4002_v0  ;;  %2933 = vmatmul.msk.bf16.gmra.mxu3 %vm3773_vm5, %v4011_v2 }
 0x142   : > { %v898_v14 = vrot.slane %v4023_v7, 7 }
 0x143   : > { %v765_v6 = vpop.f32.mrf.mxu0 }
 0x144   : > { %v794_v10 = vmul.f32 %v3724_v45, %v765_v6 }
 0x146   : > { %v818_v12 = vadd.f32 %v3734_v49, %v794_v10 }
 0x148   : > { %v4029_v15 = vmax.f32 %v818_v12, 0.0 }
 0x14a   : > { %v899_v17 = vrot.slane %v4029_v15, 7 }
 0x14b   : > { %v768_v18 = vpop.f32.mrf.mxu0 }
 0x14c   : > { %v795_v19 = vmul.f32 %v3724_v45, %v768_v18  ;;  %v900_v20 = vsel %vm873_vm0, %v898_v14, %v899_v17 }
 0x14d   : > { %v4037_v21 = vpack.c.bf16 %v900_v20, %v898_v14 }
 0x14e   : > { %v819_v24 = vadd.f32 %v3734_v49, %v795_v19  ;;  %v1610_v25 = vpop.f32.mrf.mxu1  ;;  %1805 = vmatmul.bf16.vlgmr.msrb.gmra.mxu2 %v3790_v29  ;;  %v3178_v29 = vld [vmem:[%s4500_s6 + $0x218] sm:$0xff] }
 0x14f   : > { %3017 = vmatmul.msk.bf16.gmra.mxu0 %vm3765_vm4, %v4037_v21  ;;  %3251 = vmatpush.bf16.msra.mxu2 %v3178_v29 }
 0x150   : > { %v839_v31 = vmax.f32 %v819_v24, 0.0  ;;  %1997 = vmatpush.bf16.msrb.mxu0 %v3178_v29 }
 0x151   : > { %v1659_v27 = vpop.f32.mrf.mxu2  ;;  %2937 = vmatmul.msk.bf16.vlgmr.msrb.gmra.mxu1 %vm3765_vm4, %v3796_v33  ;;  %2968 = vmatmul.msk.bf16.vlgmr.msrb.gmra.mxu3 %vm3773_vm5, %v3798_v34  ;;  %v3177_v33 = vld [vmem:[%s4500_s6 + $0x210] sm:$0xff] }
 0x152   : > { %v1660_v36 = vadd.f32 %v1659_v27, %v1610_v25  ;;  %v4062_v34 = vmul.f32 %v850_v37, %v839_v31 }
 0x153   : > { %v770_v38 = vpop.f32.mrf.mxu0  ;;  %3252 = vmatpush.bf16.msra.mxu2 %v3177_v33 }
 0x154   : > { %v796_v39 = vmul.f32 %v3724_v45, %v770_v38  ;;  %v1708_v40 = vpop.f32.mrf.mxu3  ;;  %1998 = vmatpush.bf16.msrb.mxu0 %v3177_v33  ;;  %v3176_v45 = vld [vmem:[%s4500_s6 + $0x208] sm:$0xff]  ;;  %v901_v51 = vrot.slane %v4062_v34, 7 }
 0x155   : > { %v4057_v41 = vadd.f32 %v1708_v40, %v1660_v36 }
 0x156   : > { %v820_v42 = vadd.f32 %v3734_v49, %v796_v39  ;;  %v1612_v43 = vpop.f32.mrf.mxu1 }
 0x157   : > { %3253 = vmatpush.bf16.msra.mxu2 %v3176_v45 }
 0x158   : > { %v840_v44 = vmax.f32 %v820_v42, 0.0  ;;  %1999 = vmatpush.bf16.msrb.mxu0 %v3176_v45 }
 0x159   : > { %v1661_v46 = vpop.f32.mrf.mxu2 }
 0x15a   : > { %v4068_v47 = vmul.f32 %v850_v37, %v840_v44  ;;  %v1662_v48 = vadd.f32 %v1661_v46, %v1612_v43 }
 0x15b   : > { %3254 = vmatpush.bf16.msra.mxu2 %v3175_v57 }
 0x15c   : > { %v902_v52 = vrot.slane %v4068_v47, 7  ;;  %v1710_v54 = vpop.f32.mrf.mxu3  ;;  %2000 = vmatpush.bf16.msrb.mxu0 %v3175_v57 }
 0x15d   : > { %v4072_v49 = vadd.f32 %v1710_v54, %v1662_v48 }
 0x15e   : > { %v1615_v58 = vpop.f32.mrf.mxu1  ;;  %1810 = vmatmul.bf16.gmra.mxu2 %v3815_v50  ;;  %v903_v61 = vsel %vm873_vm0, %v901_v51, %v902_v52 }
 0x15f   : > { %v3020_v63 = vpack.c.bf16 %v903_v61, %v901_v51 }
 0x161   : > { %v1664_v1 = vpop.f32.mrf.mxu2  ;;  %2941 = vmatmul.msk.bf16.gmra.mxu1 %vm3765_vm4, %v3819_v53  ;;  %2971 = vmatmul.msk.bf16.gmra.mxu3 %vm3773_vm5, %v3826_v55 }
 0x162   : > { %v1665_v3 = vadd.f32 %v1664_v1, %v1615_v58  ;;  %3021 = vmatmul.msk.bf16.gmra.mxu0 %vm3765_vm4, %v3020_v63 }
 0x164   : > { %v1713_v4 = vpop.f32.mrf.mxu3 }
 0x165   : > { %v4087_v6 = vadd.f32 %v1713_v4, %v1665_v3 }
 0x166   : > { %v1617_v10 = vpop.f32.mrf.mxu1 }
 0x169   : > { %v1666_v12 = vpop.f32.mrf.mxu2 }
 0x16a   : > { %v1667_v14 = vadd.f32 %v1666_v12, %v1617_v10 }
 0x16c   : > { %v1715_v16 = vpop.f32.mrf.mxu3  ;;  %v4089_v17 = vpop.f32.mrf.mxu0 }
 0x16d   : > { %v4091_v18 = vadd.f32 %v1715_v16, %v1667_v14 }
 0x16e   : > { %v1620_v53 = vpop.f32.mrf.mxu1  ;;  %1815 = vmatmul.bf16.gmra.mxu2 %v3843_v5 }
 0x171   : > { %v1669_v19 = vpop.f32.mrf.mxu2  ;;  %2945 = vmatmul.msk.bf16.gmra.mxu1 %vm3765_vm4, %v3847_v8  ;;  %2974 = vmatmul.msk.bf16.gmra.mxu3 %vm3773_vm5, %v3854_v11 }
 0x172   : > { %v1670_v20 = vadd.f32 %v1669_v19, %v1620_v53  ;;  %1952 = vmatmul.bf16.vlgmr.msra.gmra.mxu0 %v3815_v50 }
 0x174   : > { %v1718_v22 = vpop.f32.mrf.mxu3  ;;  %v4101_v24 = vpop.f32.mrf.mxu0 }
 0x175   : > { %v4103_v25 = vadd.f32 %v1718_v22, %v1670_v20 }
 0x176   : > { %v1622_v27 = vpop.f32.mrf.mxu1 }
 0x179   : > { %v1671_v29 = vpop.f32.mrf.mxu2 }
 0x17a   : > { %v1672_v31 = vadd.f32 %v1671_v29, %v1622_v27 }
 0x17c   : > { %v1720_v36 = vpop.f32.mrf.mxu3  ;;  %v4105_v37 = vpop.f32.mrf.mxu0 }
 0x17d   : > { %v4107_v38 = vadd.f32 %v1720_v36, %v1672_v31 }
 0x17e   : > { %v1625_v8 = vpop.f32.mrf.mxu1  ;;  %1820 = vmatmul.bf16.gmra.mxu2 %v3871_v26 }
 0x181   : > { %v1674_v39 = vpop.f32.mrf.mxu2  ;;  %2949 = vmatmul.msk.bf16.gmra.mxu1 %vm3765_vm4, %v3875_v30  ;;  %2977 = vmatmul.msk.bf16.gmra.mxu3 %vm3773_vm5, %v3882_v32 }
 0x182   : > { %v1675_v50 = vadd.f32 %v1674_v39, %v1625_v8  ;;  %3024 = vmatmul.msk.bf16.vlgmr.msrb.gmra.mxu0 %vm3773_vm5, %v3826_v55 }
 0x184   : > { %v1723_v40 = vpop.f32.mrf.mxu3  ;;  %v4119_v33 = vpop.f32.mrf.mxu0 }
 0x185   : > { %v4121_v42 = vadd.f32 %v1723_v40, %v1675_v50 }
 0x186   : > { %v1627_v43 = vpop.f32.mrf.mxu1 }
 0x189   : > { %v1676_v44 = vpop.f32.mrf.mxu2 }
 0x18a   : > { %v1677_v46 = vadd.f32 %v1676_v44, %v1627_v43  ;;  %v959_v43 = vrot.slane %v4023_v7, 1  ;;  %v960_v44 = vrot.slane %v4029_v15, 1 }
 0x18c   : > { %v1725_v45 = vpop.f32.mrf.mxu3  ;;  %v4123_v48 = vpop.f32.mrf.mxu0 }
 0x18d   : > { %v4125_v30 = vadd.f32 %v1725_v45, %v1677_v46 }
 0x18e   : > { %v1630_v51 = vpop.f32.mrf.mxu1  ;;  %1825 = vmatmul.bf16.gmra.mxu2 %v3908_v56 }
 0x191   : > { %v1679_v52 = vpop.f32.mrf.mxu2  ;;  %2953 = vmatmul.msk.bf16.gmra.mxu1 %vm3765_vm4, %v3915_v60  ;;  %2980 = vmatmul.msk.bf16.gmra.mxu3 %vm3773_vm5, %v3922_v62 }
 0x192   : > { %v1680_v55 = vadd.f32 %v1679_v52, %v1630_v51  ;;  %v4182_v52 = vpack.c.bf16 %v4029_v15, %v4023_v7 }
 0x194   : > { %v1728_v54 = vpop.f32.mrf.mxu3  ;;  %v4134_v57 = vpop.f32.mrf.mxu0 }
 0x195   : > { %v4136_v58 = vadd.f32 %v1728_v54, %v1680_v55  ;;  %v961_v55 = vsel %vm934_vm2, %v959_v43, %v960_v44  ;;  %v3188_v43 = vld [vmem:[%s4503_s9 + $0x28] sm:$0xff] }
 0x196   : > { %v1632_v61 = vpop.f32.mrf.mxu1 }
 0x199   : > { %v1681_v63 = vpop.f32.mrf.mxu2 }
 0x19a   : > { %v4138_v1 = vadd.f32 %v1681_v63, %v1632_v61  ;;  %v4186_v61 = vpack.c.bf16 %v960_v44, %v961_v55 }
 0x19c   : > { %v4140_v3 = vpop.f32.mrf.mxu3  ;;  %v4142_v4 = vpop.f32.mrf.mxu0 }
 0x19e   : > { %v1635_v10 = vpop.f32.mrf.mxu1  ;;  %1830 = vmatmul.bf16.gmra.mxu2 %v3957_v23 }
 0x1a1   : > { %v1684_v60 = vpop.f32.mrf.mxu2  ;;  %2957 = vmatmul.msk.bf16.gmra.mxu1 %vm3765_vm4, %v3964_v28  ;;  %2983 = vmatmul.msk.bf16.gmra.mxu3 %vm3773_vm5, %v3971_v35 }
 0x1a2   : > { %v1685_v12 = vadd.f32 %v1684_v60, %v1635_v10 }
 0x1a4   : > { %v1733_v14 = vpop.f32.mrf.mxu3  ;;  %v4151_v16 = vpop.f32.mrf.mxu0 }
 0x1a5   : > { %v4153_v53 = vadd.f32 %v1733_v14, %v1685_v12  ;;  %v3190_v12 = vld [vmem:[%s4503_s9 + $0x38] sm:$0xff] }
 0x1a6   : > { %v1637_v19 = vpop.f32.mrf.mxu1  ;;  %3255 = vmatpush.bf16.msra.mxu3 %v3190_v12  ;;  %2170 = vmatpush.bf16.msra.mxu0 %v3190_v12 }
 0x1a9   : > { %v1686_v20 = vpop.f32.mrf.mxu2 }
 0x1aa   : > { %v4155_v22 = vadd.f32 %v1686_v20, %v1637_v19 }
 0x1ac   : > { %v4157_v27 = vpop.f32.mrf.mxu3  ;;  %v4159_v29 = vpop.f32.mrf.mxu0 }
 0x1ae   : > { %v1640_v31 = vpop.f32.mrf.mxu1  ;;  %1835 = vmatmul.bf16.gmra.mxu2 %v3998_v59 }
 0x1b1   : > { %v1689_v28 = vpop.f32.mrf.mxu2  ;;  %2961 = vmatmul.msk.bf16.gmra.mxu1 %vm3765_vm4, %v4002_v0  ;;  %2986 = vmatmul.msk.bf16.gmra.mxu3 %vm3773_vm5, %v4011_v2 }
 0x1b2   : > { %v1690_v36 = vadd.f32 %v1689_v28, %v1640_v31 }
 0x1b4   : > { %v1738_v8 = vpop.f32.mrf.mxu3  ;;  %v4168_v39 = vpop.f32.mrf.mxu0 }
 0x1b5   : > { %v4170_v50 = vadd.f32 %v1738_v8, %v1690_v36  ;;  %v3189_v36 = vld [vmem:[%s4503_s9 + $0x30] sm:$0xff] }
 0x1b6   : > { %v1642_v40 = vpop.f32.mrf.mxu1  ;;  %3256 = vmatpush.bf16.msra.mxu3 %v3189_v36  ;;  %2171 = vmatpush.bf16.msra.mxu0 %v3189_v36  ;;  %v3183_v36 = vld [vmem:[%s4503_s9] sm:$0xff] }
 0x1b9   : > { %v1691_v46 = vpop.f32.mrf.mxu2 }
 0x1ba   : > { %v4174_v45 = vadd.f32 %v1691_v46, %v1642_v40  ;;  %2172 = vmatpush.bf16.msra.mxu0 %v3188_v43  ;;  %3257 = vmatpush.bf16.msra.mxu3 %v3188_v43 }
 0x1bc   : > { %v4176_v51 = vpop.f32.mrf.mxu3  ;;  %v4178_v0 = vpop.f32.mrf.mxu0 }
 0x1be   : > { %v1645_v54 = vpop.f32.mrf.mxu1  ;;  %1840 = vmatmul.bf16.gmra.mxu2 %v4182_v52 }
 0x1c1   : > { %v1694_v63 = vpop.f32.mrf.mxu2  ;;  %2965 = vmatmul.msk.bf16.gmra.mxu1 %vm3765_vm4, %v4037_v21  ;;  %2989 = vmatmul.msk.bf16.gmra.mxu3 %vm3773_vm5, %v4186_v61 }
 0x1c2   : > { %v1695_v10 = vadd.f32 %v1694_v63, %v1645_v54  ;;  %v3186_v54 = vld [vmem:[%s4503_s9 + $0x18] sm:$0xff] }
 0x1c4   : > { %v1743_v60 = vpop.f32.mrf.mxu3  ;;  %v4194_v7 = vpop.f32.mrf.mxu0 }
 0x1c5   : > { %v4196_v15 = vadd.f32 %v1743_v60, %v1695_v10 }
 0x1c6   : > { %v1647_v14 = vpop.f32.mrf.mxu1 }
 0x1c9   : > { %v1696_v19 = vpop.f32.mrf.mxu2 }
 0x1ca   : > { %v4201_v9 = vadd.f32 %v1696_v19, %v1647_v14  ;;  %v3184_v14 = vld [vmem:[%s4503_s9 + $0x8] sm:$0xff] }
 0x1cc   : > { %v4203_v21 = vpop.f32.mrf.mxu0 }
 0x1ce   : > { %v1757_v20 = vpop.f32.mrf.mxu1  ;;  %3027 = vmatmul.msk.bf16.vlgmr.msra.gmra.mxu2 %vm3773_vm5, %v3854_v11 }
 0x1d1   : > { %v1806_v31 = vpop.f32.mrf.mxu2  ;;  %1957 = vmatmul.bf16.vlgmr.msra.gmra.mxu1 %v3843_v5  ;;  %v3187_v5 = vld [vmem:[%s4503_s9 + $0x20] sm:$0xff] }
 0x1d2   : > { %2173 = vmatpush.bf16.msra.mxu0 %v3187_v5  ;;  %3258 = vmatpush.bf16.msra.mxu3 %v3187_v5 }
 0x1d4   : > { %v4209_v28 = vpop.f32.mrf.mxu0 }
 0x1d6   : > { %v1759_v8 = vpop.f32.mrf.mxu1  ;;  %2174 = vmatpush.bf16.msra.mxu0 %v3186_v54  ;;  %3259 = vmatpush.bf16.msra.mxu3 %v3186_v54 }
 0x1d9   : > { %v1808_v40 = vpop.f32.mrf.mxu2 }
 0x1de   : > { %v1762_v11 = vpop.f32.mrf.mxu1  ;;  %3030 = vmatmul.msk.bf16.gmra.mxu2 %vm3773_vm5, %v3882_v32  ;;  %v3185_v32 = vld [vmem:[%s4503_s9 + $0x10] sm:$0xff] }
 0x1df   : > { %v1763_v44 = vadd.f32 %v1762_v11, %v4087_v6  ;;  %v4224_v46 = vpop.f32.mrf.mxu0  ;;  %2175 = vmatpush.bf16.msra.mxu0 %v3185_v32  ;;  %3260 = vmatpush.bf16.msra.mxu3 %v3185_v32 }
 0x1e0   : > { %4534 = vst [vmem:[#allocation15_spill] sm:$0xff] %v4224_v46 }
 0x1e1   : > { %v1811_v55 = vpop.f32.mrf.mxu2  ;;  %1962 = vmatmul.bf16.gmra.mxu1 %v3871_v26  ;;  %v4238_v26 = vpop.f32.mrf.mxu3 }
 0x1e2   : > { %v4230_v63 = vadd.f32 %v1811_v55, %v1763_v44  ;;  %v1758_v44 = vadd.f32 %v1757_v20, %v4057_v41 }
 0x1e3   : > { %2176 = vmatpush.bf16.msra.mxu0 %v3184_v14  ;;  %3261 = vmatpush.bf16.msra.mxu3 %v3184_v14 }
 0x1e4   : > { %v1807_v32 = vadd.f32 %v1806_v31, %v1758_v44 }
 0x1e6   : > { %v1764_v6 = vpop.f32.mrf.mxu1 }
 0x1e7   : > { %v1765_v10 = vadd.f32 %v1764_v6, %v4091_v18  ;;  %v4236_v60 = vpop.f32.mrf.mxu0  ;;  %2177 = vmatpush.bf16.msra.mxu0 %v3183_v36  ;;  %3262 = vmatpush.bf16.msra.mxu3 %v3183_v36 }
 0x1e8   : > { %4535 = vst [vmem:[#allocation16_spill] sm:$0xff] %v4236_v60 }
 0x1e9   : > { %v1813_v12 = vpop.f32.mrf.mxu2  ;;  %v1855_v54 = vpop.f32.mrf.mxu3 }
 0x1ea   : > { %v4243_v19 = vadd.f32 %v1813_v12, %v1765_v10 }
 0x1ee   : > { %v1767_v18 = vpop.f32.mrf.mxu1  ;;  %3033 = vmatmul.msk.bf16.gmra.mxu2 %vm3773_vm5, %v3922_v62  ;;  %v1760_v62 = vadd.f32 %v1759_v8, %v4072_v49  ;;  %v4269_v8 = vld [vmem:[%s4501_s7] ss:$0 sm:$0xff] }
 0x1ef   : > { %v1768_v43 = vadd.f32 %v1767_v18, %v4103_v25  ;;  %v1953_v5 = vpop.f32.mrf.mxu0  ;;  %v1856_v25 = vadd.f32 %v1855_v54, %v1807_v32 }
 0x1f0   : > { %v1809_v36 = vadd.f32 %v1808_v40, %v1760_v62 }
 0x1f1   : > { %v1816_v11 = vpop.f32.mrf.mxu2  ;;  %1967 = vmatmul.bf16.gmra.mxu1 %v3908_v56  ;;  %v1857_v60 = vpop.f32.mrf.mxu3  ;;  %v1905_v56 = vadd.f32 %v4089_v17, %v1856_v25 }
 0x1f2   : > { %v4254_v55 = vadd.f32 %v1816_v11, %v1768_v43 }
 0x1f3   : > { %v1954_v31 = vadd.f32 %v1953_v5, %v1905_v56  ;;  %v1731_v56 = vadd.f32 %v4140_v3, %v4138_v1  ;;  %v1736_v1 = vadd.f32 %v4157_v27, %v4155_v22  ;;  %v963_v3 = vrot.slane %v4068_v47, 1 }
 0x1f4   : > { %v1023_v22 = vpack.c.bf16 %v4068_v47, %v4062_v34 }
 0x1f6   : > { %v1769_v6 = vpop.f32.mrf.mxu1 }
 0x1f7   : > { %v1770_v10 = vadd.f32 %v1769_v6, %v4107_v38  ;;  %v1955_v12 = vpop.f32.mrf.mxu0  ;;  %v1858_v38 = vadd.f32 %v1857_v60, %v1809_v36 }
 0x1f9   : > { %v1818_v14 = vpop.f32.mrf.mxu2  ;;  %v1907_v40 = vadd.f32 %v4101_v24, %v1858_v38 }
 0x1fa   : > { %v4258_v18 = vadd.f32 %v1818_v14, %v1770_v10 }
 0x1fb   : > { %v1956_v11 = vadd.f32 %v1955_v12, %v1907_v40 }
 0x1fe   : > { %v1772_v46 = vpop.f32.mrf.mxu1  ;;  %3036 = vmatmul.msk.bf16.gmra.mxu2 %vm3773_vm5, %v3971_v35 }
 0x1ff   : > { %v1773_v41 = vadd.f32 %v1772_v46, %v4121_v42  ;;  %v2002_v20 = vpop.f32.mrf.mxu0  ;;  %v4278_v42 = vld [vmem:[%s4502_s8] ss:$0 sm:$0xff] }
 0x200   : > { %v2003_v49 = vadd.f32 %v2002_v20, %v1954_v31 }
 0x201   : > { %v1821_v43 = vpop.f32.mrf.mxu2  ;;  %1972 = vmatmul.bf16.gmra.mxu1 %v3957_v23 }
 0x202   : > { %v4271_v17 = vadd.f32 %v1821_v43, %v1773_v41  ;;  %v2046_v35 = vmul.f32 %v4269_v8, %v2003_v49  ;;  %v962_v49 = vrot.slane %v4062_v34, 1  ;;  %v1746_v34 = vadd.f32 %v4238_v26, %v4201_v9 }
 0x204   : > { %v2066_v54 = vadd.f32 %v4278_v42, %v2046_v35 }
 0x206   : > { %v1774_v46 = vpop.f32.mrf.mxu1  ;;  %v2082_v10 = vmax.f32 %v2066_v54, 0.0 }
 0x207   : > { %v1775_v23 = vadd.f32 %v1774_v46, %v4125_v30  ;;  %v2004_v60 = vpop.f32.mrf.mxu0  ;;  %v964_v46 = vsel %vm934_vm2, %v962_v49, %v963_v3 }
 0x208   : > { %v2005_v5 = vadd.f32 %v2004_v60, %v1956_v11 }
 0x209   : > { %v1823_v44 = vpop.f32.mrf.mxu2 }
 0x20a   : > { %v2047_v32 = vmul.f32 %v4269_v8, %v2005_v5  ;;  %v4283_v6 = vadd.f32 %v1823_v44, %v1775_v23  ;;  %v3044_v23 = vpack.c.bf16 %v963_v3, %v964_v46  ;;  %v1741_v44 = vadd.f32 %v4176_v51, %v4174_v45 }
 0x20c   : > { %v2067_v24 = vadd.f32 %v4278_v42, %v2047_v32 }
 0x20e   : > { %v2083_v12 = vmax.f32 %v2067_v24, 0.0  ;;  %v1777_v62 = vpop.f32.mrf.mxu1  ;;  %3039 = vmatmul.msk.bf16.gmra.mxu2 %vm3773_vm5, %v4011_v2 }
 0x20f   : > { %v1778_v30 = vadd.f32 %v1777_v62, %v4136_v58 }
 0x210   : > { %v2098_v14 = vpack.c.bf16 %v2083_v12, %v2082_v10 }
 0x211   : > { %v1826_v25 = vpop.f32.mrf.mxu2  ;;  %1977 = vmatmul.bf16.gmra.mxu1 %v3998_v59 }
 0x212   : > { %v4291_v36 = vadd.f32 %v1826_v25, %v1778_v30  ;;  %2178 = vmatmul.bf16.vlgmr.msra.gmra.mxu0 %v2098_v14 }
 0x216   : > { %v1779_v41 = vpop.f32.mrf.mxu1 }
 0x217   : > { %v1780_v20 = vadd.f32 %v1779_v41, %v1731_v56 }
 0x219   : > { %v1828_v38 = vpop.f32.mrf.mxu2 }
 0x21a   : > { %v4295_v31 = vadd.f32 %v1828_v38, %v1780_v20 }
 0x21e   : > { %v1782_v43 = vpop.f32.mrf.mxu1  ;;  %3042 = vmatmul.msk.bf16.gmra.mxu2 %vm3773_vm5, %v4186_v61 }
 0x21f   : > { %v1783_v2 = vadd.f32 %v1782_v43, %v4153_v53  ;;  %v1860_v53 = vpop.f32.mrf.mxu3 }
 0x220   : > { %v1861_v45 = vadd.f32 %v1860_v53, %v4230_v63 }
 0x221   : > { %v1831_v58 = vpop.f32.mrf.mxu2  ;;  %1982 = vmatmul.bf16.gmra.mxu1 %v4182_v52 }
 0x222   : > { %v4302_v59 = vadd.f32 %v1831_v58, %v1783_v2  ;;  %v1910_v20 = vadd.f32 %v4105_v37, %v1861_v45 }
 0x226   : > { %v1784_v40 = vpop.f32.mrf.mxu1 }
 0x227   : > { %v1785_v11 = vadd.f32 %v1784_v40, %v1736_v1  ;;  %v1862_v54 = vpop.f32.mrf.mxu3 }
 0x229   : > { %v1833_v35 = vpop.f32.mrf.mxu2 }
 0x22a   : > { %v4309_v61 = vadd.f32 %v1833_v35, %v1785_v11 }
 0x22e   : > { %v1787_v60 = vpop.f32.mrf.mxu1  ;;  %3045 = vmatmul.msk.bf16.gmra.mxu2 %vm3773_vm5, %v3044_v23 }
 0x22f   : > { %v1788_v52 = vadd.f32 %v1787_v60, %v4170_v50  ;;  %v1865_v50 = vpop.f32.mrf.mxu3 }
 0x230   : > { %v1866_v63 = vadd.f32 %v1865_v50, %v4254_v55 }
 0x231   : > { %v1836_v27 = vpop.f32.mrf.mxu2  ;;  %1987 = vmatmul.bf16.gmra.mxu1 %v1023_v22 }
 0x232   : > { %v4316_v5 = vadd.f32 %v1836_v27, %v1788_v52  ;;  %v1915_v53 = vadd.f32 %v4123_v48, %v1866_v63 }
 0x236   : > { %v1789_v32 = vpop.f32.mrf.mxu1 }
 0x237   : > { %v1790_v24 = vadd.f32 %v1789_v32, %v1741_v44  ;;  %v1867_v51 = vpop.f32.mrf.mxu3 }
 0x238   : > { %v1868_v22 = vadd.f32 %v1867_v51, %v4258_v18 }
 0x239   : > { %v1838_v10 = vpop.f32.mrf.mxu2 }
 0x23a   : > { %v4320_v12 = vadd.f32 %v1838_v10, %v1790_v24  ;;  %v1917_v55 = vadd.f32 %v4134_v57, %v1868_v22 }
 0x23e   : > { %v1792_v13 = vpop.f32.mrf.mxu1 }
 0x23f   : > { %v1793_v62 = vadd.f32 %v1792_v13, %v4196_v15  ;;  %v1863_v15 = vadd.f32 %v1862_v54, %v4243_v19  ;;  %v1870_v58 = vpop.f32.mrf.mxu3 }
 0x240   : > { %v1871_v48 = vadd.f32 %v1870_v58, %v4271_v17 }
 0x241   : > { %v1841_v30 = vpop.f32.mrf.mxu2  ;;  %v1912_v1 = vadd.f32 %v4119_v33, %v1863_v15 }
 0x242   : > { %v4323_v14 = vadd.f32 %v1841_v30, %v1793_v62 }
 0x246   : > { %v1794_v47 = vpop.f32.mrf.mxu1 }
 0x247   : > { %v1795_v25 = vadd.f32 %v1794_v47, %v1746_v34  ;;  %v1872_v46 = vpop.f32.mrf.mxu3  ;;  %v1920_v47 = vadd.f32 %v4142_v4, %v1871_v48 }
 0x248   : > { %v1873_v51 = vadd.f32 %v1872_v46, %v4283_v6 }
 0x249   : > { %v1843_v56 = vpop.f32.mrf.mxu2 }
 0x24a   : > { %v4328_v41 = vadd.f32 %v1843_v56, %v1795_v25  ;;  %v1922_v17 = vadd.f32 %v4151_v16, %v1873_v51 }
 0x24e   : > { %v1958_v38 = vpop.f32.mrf.mxu1 }
 0x24f   : > { %v1959_v43 = vadd.f32 %v1958_v38, %v1910_v20  ;;  %v1875_v10 = vpop.f32.mrf.mxu3 }
 0x250   : > { %v1876_v4 = vadd.f32 %v1875_v10, %v4291_v36 }
 0x251   : > { %v2007_v2 = vpop.f32.mrf.mxu2 }
 0x252   : > { %v2008_v49 = vadd.f32 %v2007_v2, %v1959_v43  ;;  %v1925_v63 = vadd.f32 %v4159_v29, %v1876_v4 }
 0x254   : > { %v2048_v3 = vmul.f32 %v4269_v8, %v2008_v49 }
 0x256   : > { %v1960_v9 = vpop.f32.mrf.mxu1  ;;  %v2068_v35 = vadd.f32 %v4278_v42, %v2048_v3 }
 0x257   : > { %v1961_v26 = vadd.f32 %v1960_v9, %v1912_v1  ;;  %v1877_v38 = vpop.f32.mrf.mxu3 }
 0x258   : > { %v2084_v60 = vmax.f32 %v2068_v35, 0.0  ;;  %v1878_v46 = vadd.f32 %v1877_v38, %v4295_v31 }
 0x259   : > { %v2009_v40 = vpop.f32.mrf.mxu2 }
 0x25a   : > { %v2010_v11 = vadd.f32 %v2009_v40, %v1961_v26  ;;  %v1927_v36 = vadd.f32 %v4168_v39, %v1878_v46  ;;  %v4366_v39 = vld [vmem:[%s4504_s10] ss:$0 sm:$0xff] }
 0x25c   : > { %v2049_v37 = vmul.f32 %v4269_v8, %v2010_v11 }
 0x25e   : > { %v2069_v19 = vadd.f32 %v4278_v42, %v2049_v37  ;;  %v1963_v23 = vpop.f32.mrf.mxu1 }
 0x25f   : > { %v1964_v52 = vadd.f32 %v1963_v23, %v1915_v53  ;;  %v1880_v26 = vpop.f32.mrf.mxu3 }
 0x260   : > { %v2085_v33 = vmax.f32 %v2069_v19, 0.0  ;;  %v1881_v29 = vadd.f32 %v1880_v26, %v4302_v59 }
 0x261   : > { %v2012_v27 = vpop.f32.mrf.mxu2 }
 0x262   : > { %v2099_v44 = vpack.c.bf16 %v2085_v33, %v2084_v60  ;;  %v2013_v54 = vadd.f32 %v2012_v27, %v1964_v52 }
 0x264   : > { %2183 = vmatmul.bf16.vlgmr.msra.gmra.mxu3 %v2099_v44  ;;  %v2050_v13 = vmul.f32 %v4269_v8, %v2013_v54 }
 0x266   : > { %v1965_v32 = vpop.f32.mrf.mxu1  ;;  %v2070_v30 = vadd.f32 %v4278_v42, %v2050_v13 }
 0x267   : > { %v1966_v24 = vadd.f32 %v1965_v32, %v1917_v55  ;;  %v1882_v60 = vpop.f32.mrf.mxu3  ;;  %v1930_v32 = vadd.f32 %v4178_v0, %v1881_v29  ;;  %v4373_v0 = vld [vmem:[%s4505_s11] ss:$0 sm:$0xff] }
 0x268   : > { %v2086_v56 = vmax.f32 %v2070_v30, 0.0 }
 0x269   : > { %v2014_v62 = vpop.f32.mrf.mxu2 }
 0x26a   : > { %v2015_v50 = vadd.f32 %v2014_v62, %v1966_v24 }
 0x26c   : > { %v2051_v34 = vmul.f32 %v4269_v8, %v2015_v50  ;;  %v1883_v50 = vadd.f32 %v1882_v60, %v4309_v61 }
 0x26e   : > { %v2071_v18 = vadd.f32 %v4278_v42, %v2051_v34  ;;  %v1968_v25 = vpop.f32.mrf.mxu1 }
 0x26f   : > { %v1969_v45 = vadd.f32 %v1968_v25, %v1920_v47  ;;  %v1885_v13 = vpop.f32.mrf.mxu3  ;;  %v570_v47 = vld [vmem:[%s3621_s20] sm:$0xff]  }
 0x270   : > { %v2087_v57 = vmax.f32 %v2071_v18, 0.0 }
 0x271   : > { %v2017_v20 = vpop.f32.mrf.mxu2 }
 0x272   : > { %v2100_v43 = vpack.c.bf16 %v2087_v57, %v2086_v56  ;;  %v2018_v15 = vadd.f32 %v2017_v20, %v1969_v45  ;;  %v1932_v56 = vadd.f32 %v4194_v7, %v1883_v50  ;;  %v2259_v45 = vunpack.c.l.bf16 %v570_v47 }
 0x274   : > { %2188 = vmatmul.bf16.gmra.mxu3 %v2100_v43  ;;  %v2052_v49 = vmul.f32 %v4269_v8, %v2018_v15  ;;  %v2260_v15 = vunpack.c.h.bf16 %v570_v47 }
 0x276   : > { %v1970_v2 = vpop.f32.mrf.mxu1  ;;  %v2072_v3 = vadd.f32 %v4278_v42, %v2052_v49 }
 0x277   : > { %v1971_v58 = vadd.f32 %v1970_v2, %v1922_v17  ;;  %v1886_v2 = vadd.f32 %v1885_v13, %v4316_v5 }
 0x278   : > { %v2088_v35 = vmax.f32 %v2072_v3, 0.0 }
 0x279   : > { %v2019_v1 = vpop.f32.mrf.mxu2 }
 0x27a   : > { %v2020_v9 = vadd.f32 %v2019_v1, %v1971_v58  ;;  %v1887_v58 = vpop.f32.mrf.mxu3 }
 0x27b   : > { %v1888_v46 = vadd.f32 %v1887_v58, %v4320_v12 }
 0x27c   : > { %v2053_v6 = vmul.f32 %v4269_v8, %v2020_v9 }
 0x27d   : > { %v1937_v60 = vadd.f32 %v4209_v28, %v1888_v46 }
 0x27e   : > { %v2073_v40 = vadd.f32 %v4278_v42, %v2053_v6  ;;  %v1973_v11 = vpop.f32.mrf.mxu1 }
 0x27f   : > { %v1974_v37 = vadd.f32 %v1973_v11, %v1925_v63  ;;  %v1935_v63 = vadd.f32 %v4203_v21, %v1886_v2 }
 0x280   : > { %v2089_v16 = vmax.f32 %v2073_v40, 0.0 }
 0x281   : > { %v2022_v19 = vpop.f32.mrf.mxu2 }
 0x282   : > { %v2101_v53 = vpack.c.bf16 %v2089_v16, %v2088_v35  ;;  %v2023_v23 = vadd.f32 %v2022_v19, %v1974_v37 }
 0x284   : > { %2193 = vmatmul.bf16.gmra.mxu3 %v2101_v53  ;;  %v2054_v22 = vmul.f32 %v4269_v8, %v2023_v23  ;;  %v1890_v23 = vpop.f32.mrf.mxu3 }
 0x286   : > { %v1975_v33 = vpop.f32.mrf.mxu1  ;;  %v2074_v54 = vadd.f32 %v4278_v42, %v2054_v22 }
 0x287   : > { %v1976_v52 = vadd.f32 %v1975_v33, %v1927_v36 }
 0x288   : > { %v2090_v62 = vmax.f32 %v2074_v54, 0.0 }
 0x289   : > { %v2024_v27 = vpop.f32.mrf.mxu2 }
 0x28a   : > { %v2025_v44 = vadd.f32 %v2024_v27, %v1976_v52  ;;  %v1891_v27 = vadd.f32 %v1890_v23, %v4323_v14  ;;  %v4537_v14 = vld [vmem:[#allocation16_spill] sm:$0xff] }
 0x28c   : > { %v2055_v31 = vmul.f32 %v4269_v8, %v2025_v44  ;;  %v1892_v54 = vpop.f32.mrf.mxu3 }
 0x28e   : > { %v2075_v55 = vadd.f32 %v4278_v42, %v2055_v31  ;;  %v1978_v24 = vpop.f32.mrf.mxu1 }
 0x28f   : > { %v2179_v10 = vpop.f32.mrf.mxu0  ;;  %v1979_v48 = vadd.f32 %v1978_v24, %v1930_v32 }
 0x290   : > { %v2091_v59 = vmax.f32 %v2075_v55, 0.0  ;;  %v2223_v34 = vmul.f32 %v4366_v39, %v2179_v10  ;;  %v4536_v55 = vld [vmem:[#allocation15_spill] sm:$0xff] }
 0x291   : > { %v2027_v30 = vpop.f32.mrf.mxu2  ;;  %v1940_v32 = vadd.f32 %v4536_v55, %v1891_v27 }
 0x292   : > { %v2102_v18 = vpack.c.bf16 %v2091_v59, %v2090_v62  ;;  %v2028_v25 = vadd.f32 %v2027_v30, %v1979_v48  ;;  %v2243_v57 = vadd.f32 %v4373_v0, %v2223_v34  ;;  %v1893_v62 = vadd.f32 %v1892_v54, %v4328_v41 }
 0x294   : > { %2198 = vmatmul.bf16.gmra.mxu3 %v2102_v18  ;;  %v2056_v38 = vmul.f32 %v4269_v8, %v2028_v25  ;;  %v2275_v49 = vadd.f32 %v2259_v45, %v2243_v57  ;;  %v1942_v30 = vadd.f32 %v4537_v14, %v1893_v62 }
 0x296   : > { %v1980_v61 = vpop.f32.mrf.mxu1  ;;  %v2076_v4 = vadd.f32 %v4278_v42, %v2056_v38  ;;  %v2291_v3 = vmax.f32 %v2275_v49, 0.0 }
 0x297   : > { %v1981_v51 = vadd.f32 %v1980_v61, %v1932_v56  ;;  %v2181_v20 = vpop.f32.mrf.mxu0 }
 0x298   : > { %v2224_v43 = vmul.f32 %v4366_v39, %v2181_v20  ;;  %v2092_v5 = vmax.f32 %v2076_v4, 0.0 }
 0x299   : > { %v2029_v17 = vpop.f32.mrf.mxu2 }
 0x29a   : > { %v2244_v7 = vadd.f32 %v4373_v0, %v2224_v43  ;;  %v2030_v1 = vadd.f32 %v2029_v17, %v1981_v51 }
 0x29c   : > { %v2276_v9 = vadd.f32 %v2260_v15, %v2244_v7  ;;  %v2057_v26 = vmul.f32 %v4269_v8, %v2030_v1  ;;  %v572_v15 = vld [vmem:[%s3621_s20 + $0x8] sm:$0xff]  }
 0x29d   : > { %v2261_v2 = vunpack.c.l.bf16 %v572_v15  ;;  %v2262_v7 = vunpack.c.h.bf16 %v572_v15 }
 0x29e   : > { %v2292_v6 = vmax.f32 %v2276_v9, 0.0  ;;  %v2077_v40 = vadd.f32 %v4278_v42, %v2057_v26  ;;  %v1983_v11 = vpop.f32.mrf.mxu1 }
 0x29f   : > { %v1984_v37 = vadd.f32 %v1983_v11, %v1935_v63 }
 0x2a0   : > { %v3195_v35 = vpack.c.bf16 %v2292_v6, %v2291_v3  ;;  %v2093_v16 = vmax.f32 %v2077_v40, 0.0  ;;  %v574_v40 = vld [vmem:[%s3621_s20 + $0x10] sm:$0xff]  }
 0x2a1   : > { %v2032_v19 = vpop.f32.mrf.mxu2  ;;  %v2263_v11 = vunpack.c.l.bf16 %v574_v40 }
 0x2a2   : > { %3196 = vst [vmem:[%s4390_s17] sm:$0xff] %v3195_v35   ;;  %v2103_v53 = vpack.c.bf16 %v2093_v16, %v2092_v5  ;;  %v2033_v36 = vadd.f32 %v2032_v19, %v1984_v37  ;;  %v2264_v16 = vunpack.c.h.bf16 %v574_v40 }
 0x2a4   : > { %2203 = vmatmul.bf16.gmra.mxu3 %v2103_v53  ;;  %v2058_v52 = vmul.f32 %v4269_v8, %v2033_v36 }
 0x2a6   : > { %v1985_v33 = vpop.f32.mrf.mxu1  ;;  %v2078_v12 = vadd.f32 %v4278_v42, %v2058_v52 }
 0x2a7   : > { %v1986_v21 = vadd.f32 %v1985_v33, %v1937_v60 }
 0x2a8   : > { %v2094_v10 = vmax.f32 %v2078_v12, 0.0 }
 0x2a9   : > { %v2034_v22 = vpop.f32.mrf.mxu2 }
 0x2aa   : > { %v2035_v29 = vadd.f32 %v2034_v22, %v1986_v21  ;;  %v576_v21 = vld [vmem:[%s3621_s20 + $0x18] sm:$0xff]  }
 0x2ab   : > { %v2265_v22 = vunpack.c.l.bf16 %v576_v21  ;;  %v2266_v12 = vunpack.c.h.bf16 %v576_v21 }
 0x2ac   : > { %v2059_v44 = vmul.f32 %v4269_v8, %v2035_v29 }
 0x2ae   : > { %v2079_v31 = vadd.f32 %v4278_v42, %v2059_v44  ;;  %v1988_v24 = vpop.f32.mrf.mxu1 }
 0x2af   : > { %v1989_v13 = vadd.f32 %v1988_v24, %v1940_v32 }
 0x2b0   : > { %v2095_v28 = vmax.f32 %v2079_v31, 0.0 }
 0x2b1   : > { %v2037_v59 = vpop.f32.mrf.mxu2 }
 0x2b2   : > { %v2104_v48 = vpack.c.bf16 %v2095_v28, %v2094_v10  ;;  %v2038_v50 = vadd.f32 %v2037_v59, %v1989_v13  ;;  %v578_v13 = vld [vmem:[%s3621_s20 + $0x20] sm:$0xff]  }
 0x2b3   : > { %v2267_v59 = vunpack.c.l.bf16 %v578_v13  ;;  %v2268_v14 = vunpack.c.h.bf16 %v578_v13 }
 0x2b4   : > { %2208 = vmatmul.bf16.gmra.mxu3 %v2104_v48  ;;  %v2060_v47 = vmul.f32 %v4269_v8, %v2038_v50 }
 0x2b6   : > { %v1990_v34 = vpop.f32.mrf.mxu1  ;;  %v2080_v57 = vadd.f32 %v4278_v42, %v2060_v47 }
 0x2b7   : > { %v1991_v18 = vadd.f32 %v1990_v34, %v1942_v30 }
 0x2b8   : > { %v2096_v41 = vmax.f32 %v2080_v57, 0.0 }
 0x2b9   : > { %v2039_v25 = vpop.f32.mrf.mxu2 }
 0x2ba   : > { %v2040_v56 = vadd.f32 %v2039_v25, %v1991_v18 }
 0x2bc   : > { %v2061_v45 = vmul.f32 %v4269_v8, %v2040_v56 }
 0x2be   : > { %v2081_v61 = vadd.f32 %v4278_v42, %v2061_v45 }
 0x2c0   : > { %v2097_v51 = vmax.f32 %v2081_v61, 0.0  ;;  %v580_v61 = vld [vmem:[%s3621_s20 + $0x28] sm:$0xff]  }
 0x2c2   : > { %v2105_v20 = vpack.c.bf16 %v2097_v51, %v2096_v41  ;;  %v2269_v51 = vunpack.c.l.bf16 %v580_v61 }
 0x2c4   : > { %2213 = vmatmul.bf16.gmra.mxu3 %v2105_v20 }
 0x2e7   : > { %v2184_v38 = vpop.f32.mrf.mxu3 }
 0x2e8   : > { %v2225_v43 = vmul.f32 %v4366_v39, %v2184_v38 }
 0x2ea   : > { %v2245_v17 = vadd.f32 %v4373_v0, %v2225_v43  ;;  %v2270_v43 = vunpack.c.h.bf16 %v580_v61 }
 0x2ec   : > { %v2277_v8 = vadd.f32 %v2261_v2, %v2245_v17 }
 0x2ee   : > { %v2293_v4 = vmax.f32 %v2277_v8, 0.0 }
 0x2ef   : > { %v2186_v58 = vpop.f32.mrf.mxu3 }
 0x2f0   : > { %v2226_v49 = vmul.f32 %v4366_v39, %v2186_v58 }
 0x2f2   : > { %v2246_v42 = vadd.f32 %v4373_v0, %v2226_v49 }
 0x2f4   : > { %v2278_v1 = vadd.f32 %v2262_v7, %v2246_v42 }
 0x2f6   : > { %v2294_v9 = vmax.f32 %v2278_v1, 0.0  ;;  %v582_v1 = vld [vmem:[%s3621_s20 + $0x30] sm:$0xff]  }
 0x2f7   : > { %v2189_v26 = vpop.f32.mrf.mxu3 }
 0x2f8   : > { %v3200_v3 = vpack.c.bf16 %v2294_v9, %v2293_v4  ;;  %v2227_v6 = vmul.f32 %v4366_v39, %v2189_v26  ;;  %v2271_v9 = vunpack.c.l.bf16 %v582_v1 }
 0x2fa   : > { %3232 = vst [vmem:[%s4390_s17 + $0x8] sm:$0xff] %v3200_v3   ;;  %v2247_v63 = vadd.f32 %v4373_v0, %v2227_v6  ;;  %v2272_v6 = vunpack.c.h.bf16 %v582_v1 }
 0x2fc   : > { %v2279_v37 = vadd.f32 %v2263_v11, %v2247_v63 }
 0x2fe   : > { %v2295_v53 = vmax.f32 %v2279_v37, 0.0 }
 0x2ff   : > { %v2191_v5 = vpop.f32.mrf.mxu3 }
 0x300   : > { %v2228_v35 = vmul.f32 %v4366_v39, %v2191_v5 }
 0x302   : > { %v2248_v46 = vadd.f32 %v4373_v0, %v2228_v35 }
 0x304   : > { %v2280_v19 = vadd.f32 %v2264_v16, %v2248_v46 }
 0x306   : > { %v2296_v23 = vmax.f32 %v2280_v19, 0.0  ;;  %v584_v19 = vld [vmem:[%s3621_s20 + $0x38] sm:$0xff]   ;;  %s2355_s20 = sshll.u32 %s4390_s17, 4  ;;  %s2356_s20 = int_to_ptr.vmem [resolvable:$true] %s2355_s20 }
 0x307   : > { %v2194_v36 = vpop.f32.mrf.mxu3 }
 0x308   : > { %v3205_v60 = vpack.c.bf16 %v2296_v23, %v2295_v53  ;;  %v2229_v33 = vmul.f32 %v4366_v39, %v2194_v36  ;;  %v2273_v23 = vunpack.c.l.bf16 %v584_v19 }
 0x30a   : > { %3233 = vst [vmem:[%s4390_s17 + $0x10] sm:$0xff] %v3205_v60   ;;  %v2249_v52 = vadd.f32 %v4373_v0, %v2229_v33  ;;  %v2274_v33 = vunpack.c.h.bf16 %v584_v19 }
 0x30c   : > { %v2281_v44 = vadd.f32 %v2265_v22, %v2249_v52 }
 0x30e   : > { %v2297_v55 = vmax.f32 %v2281_v44, 0.0 }
 0x30f   : > { %v2196_v27 = vpop.f32.mrf.mxu3 }
 0x310   : > { %v2230_v29 = vmul.f32 %v4366_v39, %v2196_v27 }
 0x312   : > { %v2250_v54 = vadd.f32 %v4373_v0, %v2230_v29 }
 0x314   : > { %v2282_v31 = vadd.f32 %v2266_v12, %v2250_v54 }
 0x316   : > { %v2298_v32 = vmax.f32 %v2282_v31, 0.0 }
 0x317   : > { %v2199_v24 = vpop.f32.mrf.mxu3 }
 0x318   : > { %v3210_v10 = vpack.c.bf16 %v2298_v32, %v2297_v55  ;;  %v2231_v28 = vmul.f32 %v4366_v39, %v2199_v24 }
 0x31a   : > { %3234 = vst [vmem:[%s4390_s17 + $0x18] sm:$0xff] %v3210_v10   ;;  %v2251_v62 = vadd.f32 %v4373_v0, %v2231_v28 }
 0x31c   : > { %v2283_v30 = vadd.f32 %v2267_v59, %v2251_v62 }
 0x31e   : > { %v2299_v47 = vmax.f32 %v2283_v30, 0.0 }
 0x31f   : > { %v2201_v48 = vpop.f32.mrf.mxu3 }
 0x320   : > { %v2232_v50 = vmul.f32 %v4366_v39, %v2201_v48 }
 0x322   : > { %v2252_v34 = vadd.f32 %v4373_v0, %v2232_v50 }
 0x324   : > { %v2284_v18 = vadd.f32 %v2268_v14, %v2252_v34 }
 0x326   : > { %v2300_v25 = vmax.f32 %v2284_v18, 0.0 }
 0x327   : > { %v2204_v56 = vpop.f32.mrf.mxu3 }
 0x328   : > { %v3215_v57 = vpack.c.bf16 %v2300_v25, %v2299_v47  ;;  %v2233_v45 = vmul.f32 %v4366_v39, %v2204_v56 }
 0x32a   : > { %3235 = vst [vmem:[%s4390_s17 + $0x20] sm:$0xff] %v3215_v57   ;;  %v2253_v41 = vadd.f32 %v4373_v0, %v2233_v45 }
 0x32c   : > { %v2285_v15 = vadd.f32 %v2269_v51, %v2253_v41 }
 0x32e   : > { %v2301_v58 = vmax.f32 %v2285_v15, 0.0 }
 0x32f   : > { %v2206_v20 = vpop.f32.mrf.mxu3 }
 0x330   : > { %v2234_v38 = vmul.f32 %v4366_v39, %v2206_v20 }
 0x332   : > { %v2254_v17 = vadd.f32 %v4373_v0, %v2234_v38 }
 0x334   : > { %v2286_v2 = vadd.f32 %v2270_v43, %v2254_v17 }
 0x336   : > { %v2302_v49 = vmax.f32 %v2286_v2, 0.0 }
 0x337   : > { %v2209_v7 = vpop.f32.mrf.mxu3 }
 0x338   : > { %v3220_v8 = vpack.c.bf16 %v2302_v49, %v2301_v58  ;;  %v2235_v42 = vmul.f32 %v4366_v39, %v2209_v7 }
 0x33a   : > { %3236 = vst [vmem:[%s4390_s17 + $0x28] sm:$0xff] %v3220_v8   ;;  %v2255_v4 = vadd.f32 %v4373_v0, %v2235_v42 }
 0x33c   : > { %v2287_v40 = vadd.f32 %v2271_v9, %v2255_v4 }
 0x33e   : > { %v2303_v5 = vmax.f32 %v2287_v40, 0.0 }
 0x33f   : > { %v2211_v26 = vpop.f32.mrf.mxu3 }
 0x340   : > { %v2236_v3 = vmul.f32 %v4366_v39, %v2211_v26 }
 0x342   : > { %v2256_v63 = vadd.f32 %v4373_v0, %v2236_v3 }
 0x344   : > { %v2288_v11 = vadd.f32 %v2272_v6, %v2256_v63 }
 0x346   : > { %v2304_v35 = vmax.f32 %v2288_v11, 0.0 }
 0x347   : > { %v2214_v16 = vpop.f32.mrf.mxu3 }
 0x348   : > { %v3225_v37 = vpack.c.bf16 %v2304_v35, %v2303_v5  ;;  %v2237_v46 = vmul.f32 %v4366_v39, %v2214_v16 }
 0x34a   : > { %3237 = vst [vmem:[%s4390_s17 + $0x30] sm:$0xff] %v3225_v37   ;;  %v2257_v53 = vadd.f32 %v4373_v0, %v2237_v46 }
 0x34c   : > { %v2289_v21 = vadd.f32 %v2273_v23, %v2257_v53 }
 0x34e   : > { %v2305_v27 = vmax.f32 %v2289_v21, 0.0 }
 0x34f   : > { %v2216_v36 = vpop.f32.mrf.mxu3 }
 0x350   : > { %v2238_v60 = vmul.f32 %v4366_v39, %v2216_v36 }
 0x352   : > { %v2258_v52 = vadd.f32 %v4373_v0, %v2238_v60 }
 0x354   : > { %v2290_v22 = vadd.f32 %v2274_v33, %v2258_v52 }
 0x356   : > { %v2306_v29 = vmax.f32 %v2290_v22, 0.0 }
 0x358   : > { %v3230_v12 = vpack.c.bf16 %v2306_v29, %v2305_v27 }
 0x35a   : > { %3238 = vst [vmem:[%s4390_s17 + $0x38] sm:$0xff] %v3230_v12  }
 0x35b   : > { %3370 = shalt.err (!%p3367_p13)
}
 0x35c   : > { %s3440_s14 = smov 64   ;;  %s3441_s17 = smov 4  }
 0x35d   : > { %3263 = dma.vmem_to_hbm [thread:$0]  (%p3558_p3), %s2356_s20, 1024, %s2358_s28, %s2340_s30, %s3440_s14, %s3440_s14, %s3441_s17  }
 0x35e PF: > { %s4539_s23 = sld [smem:[#allocation9_spill]] }
 0x35f   : > { %s4540_s26 = sld [smem:[#allocation5_spill]] }
 0x364   : > { %p3269_p0 = scmp.ge.s32.totalorder %s4539_s23, 2 }
 0x365   : > { %s2372_s24 = sand.u32 1, %s4540_s26  }
 0x366   : > { %p3266_p1 = pnand %p3269_p0, %p3567_p8  ;;  %s2373_s21 = scalar_lea.sflag [#allocation3], %s2372_s24 }
 0x368   : > { %p3267_p2 = pneg %p3266_p1 }
 0x36a   : > { %3404 = dma.done.wait (%p3267_p2), %s2373_s21, 1024  }
 0x36b   : > { %3406 = vsyncadd (%p3267_p2), %s2373_s21, 4294966272  ;;  %s25_s28 = sadd.s32 1, %s4539_s23   ;;  %s4542_s15 = sld [smem:[#allocation6_spill]] }
 0x36c   : > { %p22_p4 = scmp.ge.s32.totalorder %s25_s28, 6   ;;  %s4543_s23 = sld [smem:[#allocation14_spill]] }
 0x36d   : > { %s4544_s24 = sld [smem:[#allocation7_spill]]  ;;  %s4548_s21 = smov %s3413_s22 }
 0x36e   : > { %s4545_s25 = sld [smem:[#allocation8_spill]]  ;;  %24 = sbr.rel (!%p22_p4) target bundleno = 5 (0x5), region = 109 }
 0x36f   : > { %s4546_s26 = sld [smem:[#allocation10_spill]] }
 0x370   : > { %s4547_s27 = sld [smem:[#allocation12_spill]] }
 0x371   : > { %s4549_s22 = smov %s4542_s15 }
 0x373   :  { %2379 = vsyncpa [#allocation3], 1 }
 0x374   :  { %2381 = vsyncpa [#allocation3 + $0x1], 1 }

</bundles_post_ra>
